<compile_context>
chip_gen: v7x
topology: tpu7x:2x2x1
jax: 0.10.0
libtpu: 0.0.40
codegen_flags: <defaults>
</compile_context>

<pallas_src>
import functools

import jax
import jax.numpy as jnp
from jax.experimental import pallas as pl


# ----------------------------------------------------------------------------
# In-kernel helpers (traced inside the fused kernels)
# ----------------------------------------------------------------------------
def _leaky_relu(x, alpha):
    return jnp.where(x > 0, x, alpha * x)


def _gcn(x, w, b, adj, alpha):
    """LeakyReLU(adj @ (x @ W) + b); matmul association picked from static
    shapes so the live intermediate is the smaller of (n_dst, d) / (n_src, d)."""
    if adj.shape[0] < x.shape[0]:
        h = jnp.dot(jnp.dot(adj, x, preferred_element_type=jnp.float32), w,
                    preferred_element_type=jnp.float32)
    else:
        h = jnp.dot(adj, jnp.dot(x, w, preferred_element_type=jnp.float32),
                    preferred_element_type=jnp.float32)
    return _leaky_relu(h + b, alpha)


# ----------------------------------------------------------------------------
# Fused Pallas kernels: one kernel per DGCN branch (even / odd)
# ----------------------------------------------------------------------------
def _even_branch_kernel(ufea_ref, vfea_ref, uv_ref, vu_ref,
                        w1_ref, b1_ref, w2_ref, b2_ref,
                        wu_ref, bu_ref, wi_ref, bi_ref,
                        user_h_ref, user_n_ref, item_h_ref, item_n_ref,
                        *, alpha):
    ufea = ufea_ref[...]
    vfea = vfea_ref[...]

    # Neighbourhood aggregations, kept entirely on-chip.
    user_n = _gcn(vfea, w1_ref[...], b1_ref[...], uv_ref[...], alpha)   # (n_user, d)
    item_n = _gcn(ufea, w2_ref[...], b2_ref[...], vu_ref[...], alpha)   # (n_item, d)

    # Union: one wide-K (K = 2d) dot over the lane-concatenated activations.
    user_h = jnp.maximum(
        jnp.dot(jnp.concatenate([ufea, user_n], axis=1), wu_ref[...],
                preferred_element_type=jnp.float32) + bu_ref[...], 0.0)
    item_h = jnp.maximum(
        jnp.dot(jnp.concatenate([vfea, item_n], axis=1), wi_ref[...],
                preferred_element_type=jnp.float32) + bi_ref[...], 0.0)

    # Four lane-dense (n, d) stores; d = 128 in the demo -> unmasked vst.
    user_h_ref[...] = user_h
    user_n_ref[...] = user_n
    item_h_ref[...] = item_h
    item_n_ref[...] = item_n


def _odd_branch_kernel(ufea0_ref, ufea1_ref, vfea0_ref, vfea1_ref, uv_ref, vu_ref,
                       w1_ref, w3_ref, b13_ref, w2_ref, w4_ref, b24_ref,
                       wu1_ref, bu1_ref, wi1_ref, bi1_ref,
                       user_out_ref, item_out_ref, *, alpha):
    ufea0 = ufea0_ref[...]
    ufea1 = ufea1_ref[...]
    vfea0 = vfea0_ref[...]
    vfea1 = vfea1_ref[...]

    # The two user-side GCNs share UV_adj: concatenate supports along lanes and
    # run a single adjacency matmul.  Column order [User_n2 | User_n1] matches
    # torch.cat((ufea[0], User_n2, User_n1), dim=1) below.
    s_user = jnp.concatenate(
        [jnp.dot(vfea1, w1_ref[...], preferred_element_type=jnp.float32),
         jnp.dot(vfea0, w3_ref[...], preferred_element_type=jnp.float32)], axis=1)
    user_n = _leaky_relu(
        jnp.dot(uv_ref[...], s_user, preferred_element_type=jnp.float32)
        + b13_ref[...], alpha)                                       # (n_user, 2d)

    s_item = jnp.concatenate(
        [jnp.dot(ufea1, w2_ref[...], preferred_element_type=jnp.float32),
         jnp.dot(ufea0, w4_ref[...], preferred_element_type=jnp.float32)], axis=1)
    item_n = _leaky_relu(
        jnp.dot(vu_ref[...], s_item, preferred_element_type=jnp.float32)
        + b24_ref[...], alpha)                                       # (n_item, 2d)

    # 3-way union: single K = 3d dot against the full (3d, d) weight.
    user_out_ref[...] = jnp.maximum(
        jnp.dot(jnp.concatenate([ufea0, user_n], axis=1), wu1_ref[...],
                preferred_element_type=jnp.float32) + bu1_ref[...], 0.0)
    item_out_ref[...] = jnp.maximum(
        jnp.dot(jnp.concatenate([vfea0, item_n], axis=1), wi1_ref[...],
                preferred_element_type=jnp.float32) + bi1_ref[...], 0.0)


# ----------------------------------------------------------------------------
# DGCNLayer in JAX (parameters built deterministically in-script)
# ----------------------------------------------------------------------------
class DGCNLayer:
    def __init__(self, opt, layer, key):
        assert opt["feature_dim"] == opt["hidden_dim"], \
            "cat() shapes in the original module require feature_dim == hidden_dim"
        self.opt = opt
        self.layer = layer
        self.alpha = opt["leakey"]
        d = opt["feature_dim"]
        keys = jax.random.split(key, 16)
        scale = 0.1

        def mk(k, shape):
            return scale * jax.random.normal(k, shape, dtype=jnp.float32)

        # GCN weights stored as (in, out) so the kernel computes x @ W directly.
        # Biases stored pre-shaped as (1, k) rows -> zero wrapper-side reshapes.
        self.gc1_w, self.gc1_b = mk(keys[0], (d, d)), mk(keys[1], (1, d))
        self.gc2_w, self.gc2_b = mk(keys[2], (d, d)), mk(keys[3], (1, d))
        self.gc3_w, self.gc3_b = mk(keys[4], (d, d)), mk(keys[5], (1, d))
        self.gc4_w, self.gc4_b = mk(keys[6], (d, d)), mk(keys[7], (1, d))
        # Concatenated GCN biases for the shared-adjacency odd branch
        # ([gc1 | gc3] for users, [gc2 | gc4] for items).
        self.gc13_b = jnp.concatenate([self.gc1_b, self.gc3_b], axis=1)   # (1, 2d)
        self.gc24_b = jnp.concatenate([self.gc2_b, self.gc4_b], axis=1)   # (1, 2d)
        # Linear(2d -> d) / Linear(3d -> d) stored pre-transposed: (2d, d) / (3d, d).
        self.user_union_w, self.user_union_b = mk(keys[8], (2 * d, d)), mk(keys[9], (1, d))
        self.item_union_w, self.item_union_b = mk(keys[10], (2 * d, d)), mk(keys[11], (1, d))
        self.user_union1_w, self.user_union1_b = mk(keys[12], (3 * d, d)), mk(keys[13], (1, d))
        self.item_union1_w, self.item_union1_b = mk(keys[14], (3 * d, d)), mk(keys[15], (1, d))

    # TODO(synk): F.dropout is active only in training mode; this implements the
    # eval-mode forward (dropout == identity).
    def forward(self, ufea, vfea, UV_adj, VU_adj):
        if self.layer % 2 == 0:
            return self._forward_even(ufea, vfea, UV_adj, VU_adj)
        return self._forward_odd(ufea, vfea, UV_adj, VU_adj)

    def _forward_even(self, ufea, vfea, UV_adj, VU_adj):
        d = self.opt["feature_dim"]
        n_user, n_item = ufea.shape[0], vfea.shape[0]
        user_h, user_n, item_h, item_n = pl.pallas_call(
            functools.partial(_even_branch_kernel, alpha=self.alpha),
            out_shape=(jax.ShapeDtypeStruct((n_user, d), jnp.float32),
                       jax.ShapeDtypeStruct((n_user, d), jnp.float32),
                       jax.ShapeDtypeStruct((n_item, d), jnp.float32),
                       jax.ShapeDtypeStruct((n_item, d), jnp.float32)),
        )(ufea, vfea, UV_adj, VU_adj,
          self.gc1_w, self.gc1_b,
          self.gc2_w, self.gc2_b,
          self.user_union_w, self.user_union_b,
          self.item_union_w, self.item_union_b)
        return ([user_h, user_n, ufea], [item_h, item_n, vfea])

    def _forward_odd(self, ufea, vfea, UV_adj, VU_adj):
        d = self.opt["feature_dim"]
        n_user, n_item = ufea[0].shape[0], vfea[0].shape[0]
        user_h, item_h = pl.pallas_call(
            functools.partial(_odd_branch_kernel, alpha=self.alpha),
            out_shape=(jax.ShapeDtypeStruct((n_user, d), jnp.float32),
                       jax.ShapeDtypeStruct((n_item, d), jnp.float32)),
        )(ufea[0], ufea[1], vfea[0], vfea[1], UV_adj, VU_adj,
          self.gc1_w, self.gc3_w, self.gc13_b,
          self.gc2_w, self.gc4_w, self.gc24_b,
          self.user_union1_w, self.user_union1_b,
          self.item_union1_w, self.item_union1_b)
        return (user_h, item_h)


# ----------------------------------------------------------------------------
# Pure-JAX reference (for correctness check)
# ----------------------------------------------------------------------------
def _gcn_ref(x, w, b, adj, alpha):
    out = adj @ (x @ w) + b
    return jnp.where(out > 0, out, alpha * out)


def _forward_ref(m, ufea, vfea, UV_adj, VU_adj):
    a = m.alpha
    if m.layer % 2 == 0:
        User_n = _gcn_ref(vfea, m.gc1_w, m.gc1_b, UV_adj, a)
        Item_n = _gcn_ref(ufea, m.gc2_w, m.gc2_b, VU_adj, a)
        User_h = jnp.maximum(jnp.concatenate([ufea, User_n], 1) @ m.user_union_w
                             + m.user_union_b, 0.0)
        Item_h = jnp.maximum(jnp.concatenate([vfea, Item_n], 1) @ m.item_union_w
                             + m.item_union_b, 0.0)
        return ([User_h, User_n, ufea], [Item_h, Item_n, vfea])
    else:
        User_n1 = _gcn_ref(vfea[0], m.gc3_w, m.gc3_b, UV_adj, a)
        User_n2 = _gcn_ref(vfea[1], m.gc1_w, m.gc1_b, UV_adj, a)
        Item_n1 = _gcn_ref(ufea[0], m.gc4_w, m.gc4_b, VU_adj, a)
        Item_n2 = _gcn_ref(ufea[1], m.gc2_w, m.gc2_b, VU_adj, a)
        User_h = jnp.maximum(jnp.concatenate([ufea[0], User_n2, User_n1], 1)
                             @ m.user_union1_w + m.user_union1_b, 0.0)
        Item_h = jnp.maximum(jnp.concatenate([vfea[0], Item_n2, Item_n1], 1)
                             @ m.item_union1_w + m.item_union1_b, 0.0)
        return (User_h, Item_h)


if __name__ == "__main__":
    # feature_dim = 128 keeps every in-kernel concat / store 128-lane aligned
    # (unmasked vst); node counts are multiples of 8 for sublane alignment.
    opt = {"feature_dim": 128, "hidden_dim": 128, "dropout": 0.0, "leakey": 0.2}
    n_user, n_item = 8, 16

    key = jax.random.PRNGKey(0)
    k_u, k_v, k_uv, k_vu, k_p0, k_p1 = jax.random.split(key, 6)

    ufea = jax.random.normal(k_u, (n_user, opt["feature_dim"]), dtype=jnp.float32)
    vfea = jax.random.normal(k_v, (n_item, opt["feature_dim"]), dtype=jnp.float32)
    # dense (normalized) bipartite adjacency matrices
    UV_adj = jax.nn.softmax(jax.random.normal(k_uv, (n_user, n_item)), axis=-1)
    VU_adj = jax.nn.softmax(jax.random.normal(k_vu, (n_item, n_user)), axis=-1)

    layer0 = DGCNLayer(opt, layer=0, key=k_p0)   # even branch
    layer1 = DGCNLayer(opt, layer=1, key=k_p1)   # odd branch

    with jax.default_matmul_precision("highest"):
        # even layer
        (user_list, item_list) = layer0.forward(ufea, vfea, UV_adj, VU_adj)
        (user_list_r, item_list_r) = _forward_ref(layer0, ufea, vfea, UV_adj, VU_adj)
        # odd layer (chained, as in the stacked DGCN model)
        user_h, item_h = layer1.forward(user_list, item_list, UV_adj, VU_adj)
        user_h_r, item_h_r = _forward_ref(layer1, user_list_r, item_list_r,
                                          UV_adj, VU_adj)

    jax.block_until_ready((user_list, item_list, user_h, item_h))

    for got, ref in zip(user_list + item_list + [user_h, item_h],
                        user_list_r + item_list_r + [user_h_r, item_h_r]):
        assert got.shape == ref.shape, "shape mismatch vs reference"
        assert jnp.allclose(got, ref, atol=1e-3, rtol=1e-3), "mismatch vs reference"

    print("KERNEL_OK")
</pallas_src>

<mosaic_0001>
module attributes {stable_mosaic.version = 11 : i64} {
  func.func @_even_branch_kernel(%arg0: memref<8x128xf32, #tpu.memory_space<vmem>>, %arg1: memref<16x128xf32, #tpu.memory_space<vmem>>, %arg2: memref<8x16xf32, #tpu.memory_space<vmem>>, %arg3: memref<16x8xf32, #tpu.memory_space<vmem>>, %arg4: memref<128x128xf32, #tpu.memory_space<vmem>>, %arg5: memref<1x128xf32, #tpu.memory_space<vmem>>, %arg6: memref<128x128xf32, #tpu.memory_space<vmem>>, %arg7: memref<1x128xf32, #tpu.memory_space<vmem>>, %arg8: memref<256x128xf32, #tpu.memory_space<vmem>>, %arg9: memref<1x128xf32, #tpu.memory_space<vmem>>, %arg10: memref<256x128xf32, #tpu.memory_space<vmem>>, %arg11: memref<1x128xf32, #tpu.memory_space<vmem>>, %arg12: memref<8x128xf32, #tpu.memory_space<vmem>>, %arg13: memref<8x128xf32, #tpu.memory_space<vmem>>, %arg14: memref<16x128xf32, #tpu.memory_space<vmem>>, %arg15: memref<16x128xf32, #tpu.memory_space<vmem>>) attributes {dimension_semantics = [], scalar_prefetch = 0 : i64, scratch_operands = 0 : i64, tpu.core_type = #tpu.core_type<tc>} {
    %c0 = arith.constant 0 : index
    %c0_0 = arith.constant 0 : index
    %0 = vector.load %arg0[%c0, %c0_0] : memref<8x128xf32, #tpu.memory_space<vmem>>, vector<8x128xf32>
    %c0_1 = arith.constant 0 : index
    %c0_2 = arith.constant 0 : index
    %1 = vector.load %arg1[%c0_1, %c0_2] : memref<16x128xf32, #tpu.memory_space<vmem>>, vector<16x128xf32>
    %c0_3 = arith.constant 0 : index
    %c0_4 = arith.constant 0 : index
    %2 = vector.load %arg4[%c0_3, %c0_4] : memref<128x128xf32, #tpu.memory_space<vmem>>, vector<128x128xf32>
    %c0_5 = arith.constant 0 : index
    %c0_6 = arith.constant 0 : index
    %3 = vector.load %arg5[%c0_5, %c0_6] : memref<1x128xf32, #tpu.memory_space<vmem>>, vector<1x128xf32>
    %c0_7 = arith.constant 0 : index
    %c0_8 = arith.constant 0 : index
    %4 = vector.load %arg2[%c0_7, %c0_8] : memref<8x16xf32, #tpu.memory_space<vmem>>, vector<8x16xf32>
    %cst = arith.constant dense<0.000000e+00> : vector<8x128xf32>
    %5 = tpu.matmul %4, %1, %cst {dimension_numbers = #tpu.dot_dimension_numbers<[1], [0], [0], [1], [0, 0, 1, 1], [], []>, precision = #tpu.contract_precision<fp32>} : vector<8x16xf32>, vector<16x128xf32>, vector<8x128xf32> -> vector<8x128xf32>
    %cst_9 = arith.constant dense<0.000000e+00> : vector<8x128xf32>
    %6 = tpu.matmul %5, %2, %cst_9 {dimension_numbers = #tpu.dot_dimension_numbers<[1], [0], [0], [1], [0, 0, 1, 1], [], []>, precision = #tpu.contract_precision<fp32>} : vector<8x128xf32>, vector<128x128xf32>, vector<8x128xf32> -> vector<8x128xf32>
    %7 = vector.broadcast %3 : vector<1x128xf32> to vector<8x128xf32>
    %8 = arith.addf %6, %7 : vector<8x128xf32>
    %cst_10 = arith.constant 0.000000e+00 : f32
    %9 = vector.broadcast %cst_10 : f32 to vector<8x128xf32>
    %10 = arith.cmpf ogt, %8, %9 : vector<8x128xf32>
    %cst_11 = arith.constant 2.000000e-01 : f32
    %11 = vector.broadcast %cst_11 : f32 to vector<8x128xf32>
    %12 = arith.mulf %11, %8 : vector<8x128xf32>
    %13 = arith.select %10, %8, %12 : vector<8x128xi1>, vector<8x128xf32>
    %c0_12 = arith.constant 0 : index
    %c0_13 = arith.constant 0 : index
    %14 = vector.load %arg6[%c0_12, %c0_13] : memref<128x128xf32, #tpu.memory_space<vmem>>, vector<128x128xf32>
    %c0_14 = arith.constant 0 : index
    %c0_15 = arith.constant 0 : index
    %15 = vector.load %arg7[%c0_14, %c0_15] : memref<1x128xf32, #tpu.memory_space<vmem>>, vector<1x128xf32>
    %c0_16 = arith.constant 0 : index
    %c0_17 = arith.constant 0 : index
    %16 = vector.load %arg3[%c0_16, %c0_17] : memref<16x8xf32, #tpu.memory_space<vmem>>, vector<16x8xf32>
    %cst_18 = arith.constant dense<0.000000e+00> : vector<8x128xf32>
    %17 = tpu.matmul %0, %14, %cst_18 {dimension_numbers = #tpu.dot_dimension_numbers<[1], [0], [0], [1], [0, 0, 1, 1], [], []>, precision = #tpu.contract_precision<fp32>} : vector<8x128xf32>, vector<128x128xf32>, vector<8x128xf32> -> vector<8x128xf32>
    %cst_19 = arith.constant dense<0.000000e+00> : vector<16x128xf32>
    %18 = tpu.matmul %16, %17, %cst_19 {dimension_numbers = #tpu.dot_dimension_numbers<[1], [0], [0], [1], [0, 0, 1, 1], [], []>, precision = #tpu.contract_precision<fp32>} : vector<16x8xf32>, vector<8x128xf32>, vector<16x128xf32> -> vector<16x128xf32>
    %19 = vector.broadcast %15 : vector<1x128xf32> to vector<16x128xf32>
    %20 = arith.addf %18, %19 : vector<16x128xf32>
    %cst_20 = arith.constant 0.000000e+00 : f32
    %21 = vector.broadcast %cst_20 : f32 to vector<16x128xf32>
    %22 = arith.cmpf ogt, %20, %21 : vector<16x128xf32>
    %cst_21 = arith.constant 2.000000e-01 : f32
    %23 = vector.broadcast %cst_21 : f32 to vector<16x128xf32>
    %24 = arith.mulf %23, %20 : vector<16x128xf32>
    %25 = arith.select %22, %20, %24 : vector<16x128xi1>, vector<16x128xf32>
    %26 = tpu.concatenate %0, %13 in 1 : vector<8x128xf32>, vector<8x128xf32> -> vector<8x256xf32>
    %c0_22 = arith.constant 0 : index
    %c0_23 = arith.constant 0 : index
    %27 = vector.load %arg8[%c0_22, %c0_23] : memref<256x128xf32, #tpu.memory_space<vmem>>, vector<256x128xf32>
    %cst_24 = arith.constant dense<0.000000e+00> : vector<8x128xf32>
    %28 = tpu.matmul %26, %27, %cst_24 {dimension_numbers = #tpu.dot_dimension_numbers<[1], [0], [0], [1], [0, 0, 1, 1], [], []>, precision = #tpu.contract_precision<fp32>} : vector<8x256xf32>, vector<256x128xf32>, vector<8x128xf32> -> vector<8x128xf32>
    %c0_25 = arith.constant 0 : index
    %c0_26 = arith.constant 0 : index
    %29 = vector.load %arg9[%c0_25, %c0_26] : memref<1x128xf32, #tpu.memory_space<vmem>>, vector<1x128xf32>
    %30 = vector.broadcast %29 : vector<1x128xf32> to vector<8x128xf32>
    %31 = arith.addf %28, %30 : vector<8x128xf32>
    %cst_27 = arith.constant 0.000000e+00 : f32
    %32 = vector.broadcast %cst_27 : f32 to vector<8x128xf32>
    %33 = arith.maximumf %31, %32 : vector<8x128xf32>
    %34 = tpu.concatenate %1, %25 in 1 : vector<16x128xf32>, vector<16x128xf32> -> vector<16x256xf32>
    %c0_28 = arith.constant 0 : index
    %c0_29 = arith.constant 0 : index
    %35 = vector.load %arg10[%c0_28, %c0_29] : memref<256x128xf32, #tpu.memory_space<vmem>>, vector<256x128xf32>
    %cst_30 = arith.constant dense<0.000000e+00> : vector<16x128xf32>
    %36 = tpu.matmul %34, %35, %cst_30 {dimension_numbers = #tpu.dot_dimension_numbers<[1], [0], [0], [1], [0, 0, 1, 1], [], []>, precision = #tpu.contract_precision<fp32>} : vector<16x256xf32>, vector<256x128xf32>, vector<16x128xf32> -> vector<16x128xf32>
    %c0_31 = arith.constant 0 : index
    %c0_32 = arith.constant 0 : index
    %37 = vector.load %arg11[%c0_31, %c0_32] : memref<1x128xf32, #tpu.memory_space<vmem>>, vector<1x128xf32>
    %38 = vector.broadcast %37 : vector<1x128xf32> to vector<16x128xf32>
    %39 = arith.addf %36, %38 : vector<16x128xf32>
    %cst_33 = arith.constant 0.000000e+00 : f32
    %40 = vector.broadcast %cst_33 : f32 to vector<16x128xf32>
    %41 = arith.maximumf %39, %40 : vector<16x128xf32>
    %c0_34 = arith.constant 0 : index
    %c0_35 = arith.constant 0 : index
    %42 = vector.load %arg12[%c0_34, %c0_35] : memref<8x128xf32, #tpu.memory_space<vmem>>, vector<8x128xf32>
    tpu.vector_store %arg12[%c0_34, %c0_35], %33 {strides = array<i32>} : memref<8x128xf32, #tpu.memory_space<vmem>>, vector<8x128xf32>,
    %c0_36 = arith.constant 0 : index
    %c0_37 = arith.constant 0 : index
    %43 = vector.load %arg13[%c0_36, %c0_37] : memref<8x128xf32, #tpu.memory_space<vmem>>, vector<8x128xf32>
    tpu.vector_store %arg13[%c0_36, %c0_37], %13 {strides = array<i32>} : memref<8x128xf32, #tpu.memory_space<vmem>>, vector<8x128xf32>,
    %c0_38 = arith.constant 0 : index
    %c0_39 = arith.constant 0 : index
    %44 = vector.load %arg14[%c0_38, %c0_39] : memref<16x128xf32, #tpu.memory_space<vmem>>, vector<16x128xf32>
    tpu.vector_store %arg14[%c0_38, %c0_39], %41 {strides = array<i32>} : memref<16x128xf32, #tpu.memory_space<vmem>>, vector<16x128xf32>,
    %c0_40 = arith.constant 0 : index
    %c0_41 = arith.constant 0 : index
    %45 = vector.load %arg15[%c0_40, %c0_41] : memref<16x128xf32, #tpu.memory_space<vmem>>, vector<16x128xf32>
    tpu.vector_store %arg15[%c0_40, %c0_41], %25 {strides = array<i32>} : memref<16x128xf32, #tpu.memory_space<vmem>>, vector<16x128xf32>,
    return
  }
}

</mosaic_0001>

<bundles_post_ra>
// kernel: tpu_custom_call.1
= control target key start
LH: loop header
LB: loop body
LE: loop exit
PB: predicated region body
PF: predicated region fallthrough
CT: control target
= control target key end

     0   :  { %s8572_s0 = inlined_call_operand.vmem [shape: f32[8,128], index: 0, kind: input, shape index: {}]   ;;  %s8573_s1 = inlined_call_operand.vmem [shape: f32[16,128], index: 1, kind: input, shape index: {}]   ;;  %s8574_s2 = inlined_call_operand.hbm [shape: f32[8,16], index: 2, kind: input, shape index: {}]   ;;  %s8575_s3 = inlined_call_operand.vmem [shape: f32[16,8], index: 3, kind: input, shape index: {}]   ;;  %s8576_s4 = inlined_call_operand.hbm [shape: f32[128,128], index: 4, kind: input, shape index: {}]   ;;  %s8577_s5 = inlined_call_operand.vmem [shape: f32[1,128], index: 5, kind: input, shape index: {}]   ;;  %s8578_s6 = inlined_call_operand.hbm [shape: f32[128,128], index: 6, kind: input, shape index: {}]   ;;  %s8579_s7 = inlined_call_operand.vmem [shape: f32[1,128], index: 7, kind: input, shape index: {}]   ;;  %s8580_s8 = inlined_call_operand.hbm [shape: f32[256,128], index: 8, kind: input, shape index: {}]   ;;  %s8581_s9 = inlined_call_operand.vmem [shape: f32[1,128], index: 9, kind: input, shape index: {}]   ;;  %s8582_s10 = inlined_call_operand.hbm [shape: f32[256,128], index: 10, kind: input, shape index: {}]   ;;  %s8583_s11 = inlined_call_operand.vmem [shape: f32[1,128], index: 11, kind: input, shape index: {}]   ;;  %s8584_s12 = inlined_call_operand.hbm [shape: f32[8,128], index: 12, kind: output, shape index: {0}]   ;;  %s8585_s13 = inlined_call_operand.hbm [shape: f32[8,128], index: 13, kind: output, shape index: {1}]   ;;  %s8586_s14 = inlined_call_operand.hbm [shape: f32[16,128], index: 14, kind: output, shape index: {2}]   ;;  %s8587_s15 = inlined_call_operand.hbm [shape: f32[16,128], index: 15, kind: output, shape index: {3}]  }
   0x1   :  { %8754 = sst [smem:[#allocation66_spill]] %s8586_s14 }
   0x2   :  { %21 = vsyncpa [#allocation3], 0 }
   0x3   :  { %22 = vsyncpa [#allocation6], 0 }
   0x4   :  { %23 = vsyncpa [#allocation9], 0 }
   0x5   :  { %24 = vsyncpa [#allocation4], 0 }
   0x6   :  { %25 = vsyncpa [#allocation13], 0 }
   0x7   :  { %26 = vsyncpa [#allocation16], 0  ;;  %s6476_s18 = smov [#allocation5]   ;;  %s6266_s22 = scalar_lea.hbm %s8576_s4, 2048 }
   0x8   :  { %s48_s19 = sshll.u32 %s6476_s18, 4  ;;  %p6267_p0 = scmp.ne.s32.totalorder %s8576_s4, %s6266_s22  ;;  %s49_s19 = int_to_ptr.vmem [resolvable:$true] %s48_s19 }
   0x9   :  { %p6270_p1 = scmp.lt.u32.totalorder %s6266_s22, %s8576_s4 }
   0xb   :  { %p6272_p2 = pnand %p6270_p1, %p6267_p0 }
   0xd   :  { %6275 = shalt.err (!%p6272_p2)
}
   0xe   :  { %s6276_s27 = scalar_lea.vmem %s49_s19, 2048  ;;  %p6281_p4 = scmp.lt.s32.totalorder %s49_s19, %s49_s19 }
   0xf   :  { %p6277_p3 = scmp.ne.s32.totalorder %s49_s19, %s6276_s27  ;;  %p6282_p5 = scmp.lt.s32.totalorder %s6276_s27, %s6276_s27 }
  0x11   :  { %p6283_p6 = por %p6282_p5, %p6281_p4 }
  0x13   :  { %p6284_p7 = pnand %p6283_p6, %p6277_p3 }
  0x15   :  { %6287 = shalt.err (!%p6284_p7)
}
  0x16   :  { %s6477_s28 = smov 128   ;;  %s6478_s29 = smov 8  }
  0x17   :  { %54 = dma.hbm_to_vmem [thread:$0]  %s8576_s4, 2048, %s49_s19, [#allocation6], %s6477_s28, %s6477_s28, %s6478_s29  }
  0x18   :  { %s6479_s17 = smov [#allocation8]   ;;  %s6480_s20 = smov [#allocation2]  }
  0x19   :  { %s76_s18 = sshll.u32 %s6479_s17, 4  ;;  %s37_s21 = sshll.u32 %s6480_s20, 4  ;;  %s77_s18 = int_to_ptr.vmem [resolvable:$true] %s76_s18  ;;  %s38_s21 = int_to_ptr.vmem [resolvable:$true] %s37_s21 }
  0x1a   :  { %s6288_s24 = scalar_lea.hbm %s8580_s8, 4096 }
  0x1b   :  { %p6289_p8 = scmp.ne.s32.totalorder %s8580_s8, %s6288_s24  ;;  %p6292_p9 = scmp.lt.u32.totalorder %s6288_s24, %s8580_s8 }
  0x1d   :  { %p6294_p10 = pnand %p6292_p9, %p6289_p8 }
  0x1f   :  { %6297 = shalt.err (!%p6294_p10)
}
  0x20   :  { %s6298_s4 = scalar_lea.vmem %s77_s18, 4096  ;;  %p6303_p12 = scmp.lt.s32.totalorder %s77_s18, %s77_s18 }
  0x21   :  { %p6299_p11 = scmp.ne.s32.totalorder %s77_s18, %s6298_s4  ;;  %p6304_p13 = scmp.lt.s32.totalorder %s6298_s4, %s6298_s4 }
  0x23   :  { %p6305_p0 = por %p6304_p13, %p6303_p12 }
  0x25   :  { %p6306_p1 = pnand %p6305_p0, %p6299_p11 }
  0x27   :  { %6309 = shalt.err (!%p6306_p1)
}
  0x28   :  { %82 = dma.hbm_to_vmem [thread:$0]  %s8580_s8, 4096, %s77_s18, [#allocation9], %s6477_s28, %s6477_s28, %s6478_s29  }
  0x29   :  { %s6310_s17 = scalar_lea.hbm %s8574_s2, 128 }
  0x2a   :  { %p6311_p2 = scmp.ne.s32.totalorder %s8574_s2, %s6310_s17  ;;  %p6314_p3 = scmp.lt.u32.totalorder %s6310_s17, %s8574_s2 }
  0x2c   :  { %p6316_p4 = pnand %p6314_p3, %p6311_p2 }
  0x2e   :  { %6319 = shalt.err (!%p6316_p4)
}
  0x2f   :  { %s6320_s25 = scalar_lea.vmem %s38_s21, 128  ;;  %p6325_p6 = scmp.lt.s32.totalorder %s38_s21, %s38_s21 }
  0x30   :  { %p6321_p5 = scmp.ne.s32.totalorder %s38_s21, %s6320_s25  ;;  %p6326_p7 = scmp.lt.s32.totalorder %s6320_s25, %s6320_s25 }
  0x32   :  { %p6327_p8 = por %p6326_p7, %p6325_p6 }
  0x34   :  { %p6328_p9 = pnand %p6327_p8, %p6321_p5 }
  0x36   :  { %6331 = shalt.err (!%p6328_p9)
}
  0x37   :  { %40 = dma.hbm_to_vmem [thread:$0]  %s8574_s2, 128, %s38_s21, [#allocation3]  }
  0x38   :  { %s6481_s26 = smov [#allocation7]   ;;  %s6482_s4 = smov [#allocation10]  }
  0x39   :  { %s62_s27 = sshll.u32 %s6481_s26, 4  ;;  %s90_s19 = sshll.u32 %s6482_s4, 4  ;;  %s63_s27 = int_to_ptr.vmem [resolvable:$true] %s62_s27  ;;  %s91_s19 = int_to_ptr.vmem [resolvable:$true] %s90_s19 }
  0x3a   :  { %s6332_s14 = scalar_lea.hbm %s8578_s6, 2048 }
  0x3b   :  { %p6333_p10 = scmp.ne.s32.totalorder %s8578_s6, %s6332_s14  ;;  %p6336_p11 = scmp.lt.u32.totalorder %s6332_s14, %s8578_s6 }
  0x3d   :  { %p6338_p12 = pnand %p6336_p11, %p6333_p10 }
  0x3f   :  { %6341 = shalt.err (!%p6338_p12)
}
  0x40   :  { %s6342_s2 = scalar_lea.vmem %s63_s27, 2048  ;;  %p6347_p0 = scmp.lt.s32.totalorder %s63_s27, %s63_s27 }
  0x41   :  { %p6343_p13 = scmp.ne.s32.totalorder %s63_s27, %s6342_s2  ;;  %p6348_p1 = scmp.lt.s32.totalorder %s6342_s2, %s6342_s2 }
  0x43   :  { %p6349_p2 = por %p6348_p1, %p6347_p0 }
  0x45   :  { %p6350_p3 = pnand %p6349_p2, %p6343_p13 }
  0x47   :  { %6353 = shalt.err (!%p6350_p3)
}
  0x48   :  { %68 = dma.hbm_to_vmem [thread:$0]  %s8578_s6, 2048, %s63_s27, [#allocation6], %s6477_s28, %s6477_s28, %s6478_s29  }
  0x49   :  { %s6354_s18 = scalar_lea.hbm %s8582_s10, 4096 }
  0x4a   :  { %p6355_p4 = scmp.ne.s32.totalorder %s8582_s10, %s6354_s18  ;;  %p6358_p5 = scmp.lt.u32.totalorder %s6354_s18, %s8582_s10 }
  0x4c   :  { %p6360_p6 = pnand %p6358_p5, %p6355_p4 }
  0x4e   :  { %6363 = shalt.err (!%p6360_p6)
}
  0x4f   :  { %s6364_s14 = scalar_lea.vmem %s91_s19, 4096  ;;  %p6369_p8 = scmp.lt.s32.totalorder %s91_s19, %s91_s19 }
  0x50   :  { %p6365_p7 = scmp.ne.s32.totalorder %s91_s19, %s6364_s14  ;;  %p6370_p9 = scmp.lt.s32.totalorder %s6364_s14, %s6364_s14 }
  0x52   :  { %p6371_p10 = por %p6370_p9, %p6369_p8 }
  0x54   :  { %p6372_p11 = pnand %p6371_p10, %p6365_p7 }
  0x56   :  { %6375 = shalt.err (!%p6372_p11)
}
  0x57   :  { %96 = dma.hbm_to_vmem [thread:$0]  %s8582_s10, 4096, %s91_s19, [#allocation9], %s6477_s28, %s6477_s28, %s6478_s29  }
  0x58   :  { %6464 = dma.done.wait [#allocation3], 128  }
  0x59   :  { %6465 = vsyncadd [#allocation3], 4294967168 }
  0x5a   :  { %6466 = dma.done.wait [#allocation6], 4096  }
  0x5b   :  { %6467 = vsyncadd [#allocation6], 4294963200 }
  0x5c   :  { %6468 = dma.done.wait [#allocation9], 8192  }
  0x5d   :  { %6469 = vsyncadd [#allocation9], 4294959104  ;;  %v6483_v0 = vmov 0.0|0.0   ;;  %vm6484_vm0 = vmmov 0   ;;  %v8591_v1 = vmov 0.0   ;;  %vm135_vm1 = vcmask 130048  }
  0x5e   :  { %5519 = vmatprep.subr.bf16.mxu0 %v6483_v0  ;;  %5031 = vmatprep.mubr.msk.f32.mxu0 %vm6484_vm0, %v8591_v1  ;;  %v115_v2 = vld [vmem:[%s8573_s1] sm:$0xff]  ;;  %v116_v3 = vld [vmem:[%s8573_s1 + $0x8] sm:$0xff]  ;;  %v1249_v26 = vld [vmem:[#allocation7 + $0x8] sm:$0xff]  ;;  %vm1914_vm2 = vcmask 64512   ;;  %s6486_s18 = smov [#allocation12]  }
  0x5f   :  { %5537 = vmatprep.subr.bf16.mxu1 %v6483_v0  ;;  %5101 = vmatprep.mubr.msk.f32.mxu1 %vm6484_vm0, %v8591_v1  ;;  %v134_v4 = vld [vmem:[#allocation2] sm:$0xff]  ;;  %v6654_v5 = vand.u32 4294901760, %v115_v2  ;;  %v6656_v6 = vand.u32 4294901760, %v116_v3  ;;  %v1248_v25 = vld [vmem:[#allocation7] sm:$0xff]  ;;  %v1271_v28 = vand.u32 4294901760, %v1249_v26  ;;  %v1250_v29 = vld [vmem:[#allocation7 + $0x10] sm:$0xff] }
  0x60   :  { %v137_v7 = vsel %vm135_vm1, %v134_v4, 0  ;;  %v1268_v27 = vand.u32 4294901760, %v1248_v25  ;;  %v1251_v30 = vld [vmem:[#allocation7 + $0x18] sm:$0xff]  ;;  %v1274_v33 = vand.u32 4294901760, %v1250_v29  ;;  %v1252_v35 = vld [vmem:[#allocation7 + $0x20] sm:$0xff]  ;;  %v1253_v36 = vld [vmem:[#allocation7 + $0x28] sm:$0xff] }
  0x61   :  { %8755 = vst [vmem:[#allocation23_spill] sm:$0xff] %v6654_v5  ;;  %8756 = vst [vmem:[#allocation24_spill] sm:$0xff] %v6656_v6  ;;  %v206_v8 = vand.u32 4294901760, %v137_v7  ;;  %v5520_v9 = vpack.c.bf16 %v6656_v6, %v6654_v5  ;;  %v6661_v10 = vsub.f32 %v115_v2, %v6654_v5  ;;  %v6664_v11 = vsub.f32 %v116_v3, %v6656_v6  ;;  %v1254_v44 = vld [vmem:[#allocation7 + $0x30] sm:$0xff]  ;;  %v1255_v45 = vld [vmem:[#allocation7 + $0x38] sm:$0xff]  ;;  %s4299_s26 = sshll.u32 %s6486_s18, 4  ;;  %s4300_s26 = int_to_ptr.vmem [resolvable:$true] %s4299_s26 }
  0x62   :  { %v6701_v31 = vsub.f32 %v1248_v25, %v1268_v27  ;;  %v6703_v32 = vsub.f32 %v1249_v26, %v1271_v28  ;;  %v1277_v34 = vand.u32 4294901760, %v1251_v30  ;;  %v6706_v37 = vsub.f32 %v1250_v29, %v1274_v33  ;;  %v1256_v55 = vld [vmem:[#allocation7 + $0x40] sm:$0xff]  ;;  %v1257_v56 = vld [vmem:[#allocation7 + $0x48] sm:$0xff]  ;;  %v1258_v2 = vld [vmem:[#allocation7 + $0x50] sm:$0xff]  ;;  %s6376_s4 = scalar_lea.vmem %s4300_s26, 128  ;;  %p6381_p13 = scmp.lt.s32.totalorder %s4300_s26, %s4300_s26 }
  0x63   :  { %8757 = vst [vmem:[#allocation25_spill] sm:$0xff] %v6661_v10  ;;  %8758 = vst [vmem:[#allocation26_spill] sm:$0xff] %v6664_v11  ;;  %v207_v12 = vsub.f32 %v137_v7, %v206_v8  ;;  %5521 = vmatpush3.bf16.msra.mxu0 %v5520_v9  ;;  %v6667_v13 = vand.u32 4294901760, %v6661_v10  ;;  %v6670_v14 = vand.u32 4294901760, %v6664_v11  ;;  %v5526_v23 = vpack.c.bf16 %v6664_v11, %v6661_v10  ;;  %v1259_v4 = vld [vmem:[#allocation7 + $0x58] sm:$0xff]  ;;  %p6377_p12 = scmp.ne.s32.totalorder %s4300_s26, %s6376_s4  ;;  %p6382_p0 = scmp.lt.s32.totalorder %s6376_s4, %s6376_s4 }
  0x64   :  { %5522 = vmatprep.subr.bf16.mxu0 %v6483_v0  ;;  %v6708_v38 = vsub.f32 %v1251_v30, %v1277_v34  ;;  %v6710_v39 = vpack.c.bf16 %v1271_v28, %v1268_v27  ;;  %v1361_v40 = vand.u32 4294901760, %v6701_v31  ;;  %v1368_v41 = vand.u32 4294901760, %v6703_v32 }
  0x65   :  { %8759 = vst [vmem:[#allocation27_spill] sm:$0xff] %v6667_v13  ;;  %8760 = vst [vmem:[#allocation28_spill] sm:$0xff] %v6670_v14  ;;  %v208_v15 = vand.u32 4294901760, %v207_v12  ;;  %v220_v16 = vsub.f32 %v6661_v10, %v6667_v13  ;;  %v227_v17 = vsub.f32 %v6664_v11, %v6670_v14  ;;  %v5532_v24 = vpack.c.bf16 %v6670_v14, %v6667_v13  ;;  %p6383_p1 = por %p6382_p0, %p6381_p13 }
  0x66   :  { %v1280_v42 = vand.u32 4294901760, %v1252_v35  ;;  %v1283_v43 = vand.u32 4294901760, %v1253_v36  ;;  %v6718_v46 = vpack.c.bf16 %v1368_v41, %v1361_v40  ;;  %v1375_v49 = vand.u32 4294901760, %v6706_v37 }
  0x67   :  { %v209_v18 = vsub.f32 %v207_v12, %v208_v15  ;;  %v6677_v19 = vand.u32 4294901760, %v220_v16  ;;  %v6679_v20 = vand.u32 4294901760, %v227_v17  ;;  %v1382_v50 = vand.u32 4294901760, %v6708_v38  ;;  %v114_v17 = vld [vmem:[%s8572_s0] sm:$0xff]  ;;  %p6384_p2 = pnand %p6383_p1, %p6377_p12 }
  0x68   :  { %v6720_v47 = vsub.f32 %v1252_v35, %v1280_v42  ;;  %v6722_v48 = vsub.f32 %v1253_v36, %v1283_v43  ;;  %v6727_v51 = vpack.c.bf16 %v1277_v34, %v1274_v33  ;;  %v1286_v52 = vand.u32 4294901760, %v1254_v44  ;;  %v1262_v34 = vld [vmem:[#allocation7 + $0x70] sm:$0xff] }
  0x69   :  { %8761 = vst [vmem:[#allocation29_spill] sm:$0xff] %v6677_v19  ;;  %8762 = vst [vmem:[#allocation30_spill] sm:$0xff] %v6679_v20  ;;  %v210_v21 = vand.u32 4294901760, %v209_v18  ;;  %v5523_v22 = vpack.c.bf16 %v6679_v20, %v6677_v19  ;;  %v1289_v53 = vand.u32 4294901760, %v1255_v45  ;;  %v6736_v54 = vpack.c.bf16 %v1382_v50, %v1375_v49 }
  0x6a   :  { %v6738_v57 = vsub.f32 %v1254_v44, %v1286_v52  ;;  %v1389_v59 = vand.u32 4294901760, %v6720_v47  ;;  %v1396_v60 = vand.u32 4294901760, %v6722_v48  ;;  %v6745_v61 = vpack.c.bf16 %v1283_v43, %v1280_v42  ;;  %v1263_v42 = vld [vmem:[#allocation7 + $0x78] sm:$0xff] }
  0x6b   :  { %5032 = vmatmul.mubr.f32.vlgmr.msra.gmra.mrb[0].mxu0 %v210_v21  ;;  %v6740_v58 = vsub.f32 %v1255_v45, %v1289_v53  ;;  %v1292_v62 = vand.u32 4294901760, %v1256_v55  ;;  %v1295_v63 = vand.u32 4294901760, %v1257_v56  ;;  %v1298_v16 = vand.u32 4294901760, %v1258_v2  ;;  %v1260_v21 = vld [vmem:[#allocation7 + $0x60] sm:$0xff] }
  0x6c   :  { %5524 = vmatpush3.bf16.msra.mxu0 %v5523_v22  ;;  %5038 = vmatprep.mubr.msk.f32.mxu0 %vm6484_vm0, %v8591_v1  ;;  %v6752_v3 = vpack.c.bf16 %v1396_v60, %v1389_v59  ;;  %v1301_v18 = vand.u32 4294901760, %v1259_v4  ;;  %v6777_v26 = vand.u32 4294901760, %v114_v17  ;;  %v1304_v30 = vand.u32 4294901760, %v1260_v21 }
  0x6d   :  { %5525 = vmatprep.subr.bf16.mxu0 %v6483_v0  ;;  %v6754_v7 = vsub.f32 %v1256_v55, %v1292_v62  ;;  %v6782_v29 = vpack.c.bf16 %v1295_v63, %v1292_v62  ;;  %v1310_v55 = vand.u32 4294901760, %v1262_v34  ;;  %v5736_v19 = vpack.c.bf16 %v6722_v48, %v6720_v47 }
  0x6e   :  { %v6775_v25 = vsub.f32 %v1259_v4, %v1301_v18  ;;  %8763 = vst [vmem:[#allocation31_spill] sm:$0xff] %v6777_v26  ;;  %v6791_v36 = vsub.f32 %v1260_v21, %v1304_v30  ;;  %v6796_v44 = vsub.f32 %v114_v17, %v6777_v26 }
  0x6f   :  { %v8590_v27 = vand.u32 4294901760, %v6754_v7  ;;  %v8770_v13 = vand.u32 4294901760, %v6754_v7 }
  0x70   :  { %8764 = vst [vmem:[#allocation32_spill] sm:$0xff] %v6796_v44  ;;  %v6811_v4 = vand.u32 4294901760, %v6796_v44  ;;  %v1445_v17 = vand.u32 4294901760, %v6791_v36 }
  0x72   :  { %8765 = vst [vmem:[#allocation33_spill] sm:$0xff] %v6811_v4 }
  0x73   :  { %5039 = vmatmul.mubr.f32.vlgmr.msra.gmra.mrb[0].mxu0 %v206_v8 }
  0x74   :  { %5527 = vmatpush3.bf16.msra.mxu0 %v5526_v23  ;;  %5045 = vmatprep.mubr.msk.f32.mxu0 %vm6484_vm0, %v8591_v1  ;;  %v6773_v23 = vsub.f32 %v1258_v2, %v1298_v16 }
  0x75   :  { %5528 = vmatprep.subr.bf16.mxu0 %v6483_v0 }
  0x76   :  { %v1431_v45 = vand.u32 4294901760, %v6773_v23 }
  0x7b   :  { %5046 = vmatmul.mubr.f32.vlgmr.msra.gmra.mrb[0].mxu0 %v207_v12  ;;  %v8593_v12 = vand.u32 4294901760, %v6740_v58 }
  0x7c   :  { %5530 = vmatpush3.bf16.msra.mxu0 %v5520_v9  ;;  %5052 = vmatprep.mubr.msk.f32.mxu0 %vm6484_vm0, %v8591_v1 }
  0x7d   :  { %5531 = vmatprep.subr.bf16.mxu0 %v6483_v0 }
  0x83   :  { %5053 = vmatmul.mubr.f32.vlgmr.msra.gmra.mrb[0].mxu0 %v208_v15  ;;  %v6761_v15 = vpack.c.bf16 %v1289_v53, %v1286_v52  ;;  %v1438_v52 = vand.u32 4294901760, %v6775_v25  ;;  %v6801_v53 = vpack.c.bf16 %v1301_v18, %v1298_v16  ;;  %v1362_v18 = vsub.f32 %v6701_v31, %v1361_v40 }
  0x84   :  { %5533 = vmatpush3.bf16.msra.mxu0 %v5532_v24  ;;  %5059 = vmatprep.mubr.msk.f32.mxu0 %vm6484_vm0, %v8591_v1  ;;  %v1261_v24 = vld [vmem:[#allocation7 + $0x68] sm:$0xff] }
  0x85   :  { %5534 = vmatprep.subr.bf16.mxu0 %v6483_v0  ;;  %v1307_v33 = vand.u32 4294901760, %v1261_v24  ;;  %v6804_v62 = vpack.c.bf16 %v1438_v52, %v1431_v45  ;;  %v1363_v40 = vand.u32 4294901760, %v1362_v18 }
  0x87   :  { %v6793_v43 = vsub.f32 %v1261_v24, %v1307_v33  ;;  %v6816_v16 = vpack.c.bf16 %v1307_v33, %v1304_v30  ;;  %v1369_v24 = vsub.f32 %v6703_v32, %v1368_v41  ;;  %v1376_v41 = vsub.f32 %v6706_v37, %v1375_v49 }
  0x88   :  { %v1397_v49 = vsub.f32 %v6722_v48, %v1396_v60 }
  0x89   :  { %v1452_v21 = vand.u32 4294901760, %v6793_v43 }
  0x8a   :  { %v1398_v10 = vand.u32 4294901760, %v1397_v49 }
  0x8b   :  { %5060 = vmatmul.mubr.f32.vlgmr.msra.gmra.mrb[0].mxu0 %v206_v8 }
  0x8c   :  { %5536 = vmatpush3.bf16.msra.mxu0 %v5520_v9  ;;  %5066 = vmatprep.mubr.msk.f32.mxu0 %vm6484_vm0, %v8591_v1  ;;  %v8594_v9 = vand.u32 4294901760, %v6738_v57 }
  0x8d   :  { %5681 = vmatprep.subr.bf16.mxu0 %v6483_v0 }
  0x8e   :  { %v6771_v22 = vpack.c.bf16 %v8593_v12, %v8594_v9  ;;  %v1390_v12 = vsub.f32 %v6720_v47, %v1389_v59  ;;  %v5739_v47 = vpack.c.bf16 %v6740_v58, %v6738_v57 }
  0x90   :  { %v1391_v59 = vand.u32 4294901760, %v1390_v12 }
  0x93   :  { %5067 = vmatmul.mubr.f32.vlgmr.msra.gmra.mrb[0].mxu0 %v206_v8  ;;  %v6756_v8 = vsub.f32 %v1257_v56, %v1295_v63  ;;  %v1313_v56 = vand.u32 4294901760, %v1263_v42  ;;  %v6806_v63 = vsub.f32 %v1262_v34, %v1310_v55  ;;  %v6825_v34 = vpack.c.bf16 %v1452_v21, %v1445_v17 }
  0x94   :  { %5683 = vmatpush3.bf16.msra.mxu0 %v6710_v39  ;;  %5311 = vmatprep.mubr.msk.f32.mxu0 %vm6484_vm0, %v8591_v1 }
  0x95   :  { %5684 = vmatprep.subr.bf16.mxu0 %v6483_v0  ;;  %v8589_v28 = vand.u32 4294901760, %v6756_v8  ;;  %v6808_v2 = vsub.f32 %v1263_v42, %v1313_v56  ;;  %v6827_v42 = vpack.c.bf16 %v1313_v56, %v1310_v55  ;;  %v1459_v30 = vand.u32 4294901760, %v6806_v63 }
  0x96   :  { %v1383_v55 = vsub.f32 %v6708_v38, %v1382_v50  ;;  %v8767_v50 = vand.u32 4294901760, %v6738_v57 }
  0x97   :  { %v6789_v35 = vpack.c.bf16 %v8589_v28, %v8590_v27  ;;  %v1351_v28 = vsub.f32 %v6796_v44, %v6811_v4  ;;  %v1466_v33 = vand.u32 4294901760, %v6808_v2  ;;  %v1370_v27 = vand.u32 4294901760, %v1369_v24 }
  0x98   :  { %5686 = vmatpush3.bf16.msra.mxu0 %v6727_v51  ;;  %v1377_v24 = vand.u32 4294901760, %v1376_v41  ;;  %v1384_v9 = vand.u32 4294901760, %v1383_v55  ;;  %v8769_v41 = vmov 0.0   ;;  %v5712_v55 = vpack.c.bf16 %v1398_v10, %v1391_v59 }
  0x99   :  { %5687 = vmatprep.subr.bf16.mxu0 %v6483_v0  ;;  %v6841_v56 = vpack.c.bf16 %v1466_v33, %v1459_v30  ;;  %v6843_v1 = vand.u32 4294901760, %v1351_v28  ;;  %v5706_v18 = vpack.c.bf16 %v1370_v27, %v1363_v40  ;;  %v1404_v28 = vsub.f32 %v6738_v57, %v8767_v50 }
  0x9a   :  { %v5709_v11 = vpack.c.bf16 %v1384_v9, %v1377_v24  ;;  %v8768_v27 = vand.u32 4294901760, %v6740_v58  ;;  %v8771_v9 = vand.u32 4294901760, %v6756_v8  ;;  %v1432_v24 = vsub.f32 %v6773_v23, %v1431_v45 }
  0x9b   :  { %8766 = vst [vmem:[#allocation34_spill] sm:$0xff] %v6843_v1  ;;  %v1405_v60 = vand.u32 4294901760, %v1404_v28  ;;  %v1446_v10 = vsub.f32 %v6791_v36, %v1445_v17  ;;  %v1460_v45 = vsub.f32 %v6806_v63, %v1459_v30  ;;  %v118_v30 = vld [vmem:[#allocation5 + $0x8] sm:$0xff]  ;;  %v5745_v57 = vpack.c.bf16 %v6775_v25, %v6773_v23  ;;  %v132_v23 = vld [vmem:[#allocation5 + $0x78] sm:$0xff] }
  0x9c   :  { %5689 = vmatpush3.bf16.msra.mxu0 %v6745_v61  ;;  %v1411_v40 = vsub.f32 %v6740_v58, %v8768_v27  ;;  %v1425_v12 = vsub.f32 %v6756_v8, %v8771_v9  ;;  %v1433_v28 = vand.u32 4294901760, %v1432_v24  ;;  %v129_v58 = vld [vmem:[#allocation5 + $0x60] sm:$0xff] }
  0x9d   :  { %5690 = vmatprep.subr.bf16.mxu0 %v6483_v0 }
  0x9e   :  { %v1412_v14 = vand.u32 4294901760, %v1411_v40  ;;  %v1426_v27 = vand.u32 4294901760, %v1425_v12  ;;  %v1453_v40 = vsub.f32 %v6793_v43, %v1452_v21  ;;  %v117_v12 = vld [vmem:[#allocation5] sm:$0xff] }
  0x9f   :  { %v605_v24 = vand.u32 4294901760, %v117_v12 }
  0xa0   :  { %5692 = vmatpush3.bf16.msra.mxu0 %v6761_v15  ;;  %v5715_v49 = vpack.c.bf16 %v1412_v14, %v1405_v60  ;;  %v1447_v60 = vand.u32 4294901760, %v1446_v10  ;;  %v119_v10 = vld [vmem:[#allocation5 + $0x10] sm:$0xff] }
  0xa1   :  { %5693 = vmatprep.subr.bf16.mxu0 %v6483_v0 }
  0xa4   :  { %5695 = vmatpush3.bf16.msra.mxu0 %v6782_v29 }
  0xa5   :  { %5696 = vmatprep.subr.bf16.mxu0 %v6483_v0 }
  0xa8   :  { %5698 = vmatpush3.bf16.msra.mxu0 %v6801_v53 }
  0xa9   :  { %5699 = vmatprep.subr.bf16.mxu0 %v6483_v0 }
  0xac   :  { %5701 = vmatpush3.bf16.msra.mxu0 %v6816_v16 }
  0xad   :  { %5702 = vmatprep.subr.bf16.mxu0 %v6483_v0 }
  0xb0   :  { %5704 = vmatpush3.bf16.msra.mxu0 %v6827_v42 }
  0xb1   :  { %5705 = vmatprep.subr.bf16.mxu0 %v6483_v0 }
  0xb3   :  { %5312 = vmatmul.mubr.f32.vlgmr.msra.gmra.mrb[2].mxu0 %v6843_v1 }
  0xb4   :  { %5707 = vmatpush3.bf16.msra.mxu0 %v5706_v18  ;;  %5346 = vmatprep.mubr.msk.f32.mxu0 %vm6484_vm0, %v8769_v41  ;;  %v1418_v18 = vsub.f32 %v6754_v7, %v8770_v13 }
  0xb5   :  { %5708 = vmatprep.subr.bf16.mxu0 %v6483_v0 }
  0xb6   :  { %v1419_v50 = vand.u32 4294901760, %v1418_v18  ;;  %v1461_v18 = vand.u32 4294901760, %v1460_v45  ;;  %v123_v45 = vld [vmem:[#allocation5 + $0x30] sm:$0xff] }
  0xb8   :  { %5710 = vmatpush3.bf16.msra.mxu0 %v5709_v11  ;;  %v1439_v11 = vsub.f32 %v6775_v25, %v1438_v52  ;;  %v5718_v13 = vpack.c.bf16 %v1426_v27, %v1419_v50  ;;  %v1467_v52 = vsub.f32 %v6808_v2, %v1466_v33  ;;  %v5730_v33 = vpack.c.bf16 %v6703_v32, %v6701_v31  ;;  %v121_v31 = vld [vmem:[#allocation5 + $0x20] sm:$0xff]  ;;  %v122_v32 = vld [vmem:[#allocation5 + $0x28] sm:$0xff] }
  0xb9   :  { %5711 = vmatprep.subr.bf16.mxu0 %v6483_v0  ;;  %v6885_v27 = vsub.f32 %v117_v12, %v605_v24  ;;  %v127_v12 = vld [vmem:[#allocation5 + $0x50] sm:$0xff] }
  0xba   :  { %v1440_v59 = vand.u32 4294901760, %v1439_v11  ;;  %v1468_v9 = vand.u32 4294901760, %v1467_v52  ;;  %v617_v52 = vand.u32 4294901760, %v121_v31 }
  0xbc   :  { %5713 = vmatpush3.bf16.msra.mxu0 %v5712_v55  ;;  %v5721_v14 = vpack.c.bf16 %v1440_v59, %v1433_v28  ;;  %v1454_v55 = vand.u32 4294901760, %v1453_v40  ;;  %v5727_v21 = vpack.c.bf16 %v1468_v9, %v1461_v18  ;;  %v611_v28 = vand.u32 4294901760, %v119_v10  ;;  %v125_v18 = vld [vmem:[#allocation5 + $0x40] sm:$0xff]  ;;  %v126_v9 = vld [vmem:[#allocation5 + $0x48] sm:$0xff] }
  0xbd   :  { %5714 = vmatprep.subr.bf16.mxu0 %v6483_v0  ;;  %v5733_v40 = vpack.c.bf16 %v6708_v38, %v6706_v37  ;;  %v620_v37 = vand.u32 4294901760, %v122_v32  ;;  %v623_v38 = vand.u32 4294901760, %v123_v45 }
  0xbe   :  { %v5724_v17 = vpack.c.bf16 %v1454_v55, %v1447_v60  ;;  %v6899_v60 = vsub.f32 %v119_v10, %v611_v28  ;;  %v635_v10 = vand.u32 4294901760, %v127_v12 }
  0xc0   :  { %5716 = vmatpush3.bf16.msra.mxu0 %v5715_v49  ;;  %v608_v49 = vand.u32 4294901760, %v118_v30  ;;  %v6923_v1 = vsub.f32 %v127_v12, %v635_v10 }
  0xc1   :  { %5717 = vmatprep.subr.bf16.mxu0 %v6483_v0 }
  0xc2   :  { %v6883_v50 = vpack.c.bf16 %v608_v49, %v605_v24  ;;  %v6887_v11 = vsub.f32 %v118_v30, %v608_v49  ;;  %v128_v30 = vld [vmem:[#allocation5 + $0x58] sm:$0xff]  ;;  %v6905_v24 = vsub.f32 %v121_v31, %v617_v52  ;;  %v629_v49 = vand.u32 4294901760, %v125_v18 }
  0xc3   :  { %v638_v20 = vand.u32 4294901760, %v128_v30 }
  0xc4   :  { %5719 = vmatpush3.bf16.msra.mxu0 %v5718_v13  ;;  %v120_v13 = vld [vmem:[#allocation5 + $0x18] sm:$0xff]  ;;  %5539 = vmatpush3.bf16.msra.mxu1 %v6883_v50  ;;  %v6918_v31 = vsub.f32 %v125_v18, %v629_v49  ;;  %v131_v18 = vld [vmem:[#allocation5 + $0x70] sm:$0xff] }
  0xc5   :  { %5720 = vmatprep.subr.bf16.mxu0 %v6483_v0  ;;  %v614_v59 = vand.u32 4294901760, %v120_v13  ;;  %5540 = vmatprep.subr.bf16.mxu1 %v6483_v0  ;;  %v647_v25 = vand.u32 4294901760, %v131_v18 }
  0xc7   :  { %v6901_v55 = vsub.f32 %v120_v13, %v614_v59  ;;  %v6908_v13 = vpack.c.bf16 %v620_v37, %v617_v52  ;;  %v6925_v52 = vsub.f32 %v128_v30, %v638_v20  ;;  %v6967_v30 = vsub.f32 %v131_v18, %v647_v25 }
  0xc8   :  { %5722 = vmatpush3.bf16.msra.mxu0 %v5721_v14  ;;  %v6897_v14 = vpack.c.bf16 %v614_v59, %v611_v28  ;;  %v6910_v28 = vsub.f32 %v122_v32, %v620_v37  ;;  %v6912_v59 = vsub.f32 %v123_v45, %v623_v38  ;;  %v130_v45 = vld [vmem:[#allocation5 + $0x68] sm:$0xff]  ;;  %v698_v37 = vand.u32 4294901760, %v6885_v27 }
  0xc9   :  { %5723 = vmatprep.subr.bf16.mxu0 %v6483_v0 }
  0xca   :  { %5542 = vmatpush3.bf16.msra.mxu1 %v6897_v14  ;;  %v8608_v18 = vand.u32 4294901760, %v6910_v28 }
  0xcb   :  { %5543 = vmatprep.subr.bf16.mxu1 %v6483_v0 }
  0xcc   :  { %5725 = vmatpush3.bf16.msra.mxu0 %v5724_v17  ;;  %v124_v17 = vld [vmem:[#allocation5 + $0x38] sm:$0xff] }
  0xcd   :  { %5726 = vmatprep.subr.bf16.mxu0 %v6483_v0 }
  0xce   :  { %5545 = vmatpush3.bf16.msra.mxu1 %v6908_v13 }
  0xcf   :  { %5546 = vmatprep.subr.bf16.mxu1 %v6483_v0 }
  0xd0   :  { %5728 = vmatpush3.bf16.msra.mxu0 %v5727_v21  ;;  %v626_v21 = vand.u32 4294901760, %v124_v17 }
  0xd1   :  { %5729 = vmatprep.subr.bf16.mxu0 %v6483_v0 }
  0xd2   :  { %v6916_v6 = vsub.f32 %v124_v17, %v626_v21  ;;  %v6928_v32 = vpack.c.bf16 %v626_v21, %v623_v38  ;;  %v641_v17 = vand.u32 4294901760, %v129_v58  ;;  %v705_v38 = vand.u32 4294901760, %v6887_v11 }
  0xd3   :  { %5347 = vmatmul.mubr.f32.vlgmr.msra.gmra.mrb[2].mxu0 %v6777_v26  ;;  %v5751_v21 = vpack.c.bf16 %v6808_v2, %v6806_v63 }
  0xd4   :  { %5731 = vmatpush3.bf16.msra.mxu0 %v5730_v33  ;;  %5381 = vmatprep.mubr.msk.f32.mxu0 %vm6484_vm0, %v8769_v41  ;;  %v632_v33 = vand.u32 4294901760, %v126_v9  ;;  %v6960_v12 = vsub.f32 %v129_v58, %v641_v17  ;;  %v706_v63 = vsub.f32 %v6887_v11, %v705_v38 }
  0xd5   :  { %5732 = vmatprep.subr.bf16.mxu0 %v6483_v0  ;;  %5548 = vmatpush3.bf16.msra.mxu1 %v6928_v32 }
  0xd6   :  { %v6920_v5 = vsub.f32 %v126_v9, %v632_v33  ;;  %v6935_v48 = vpack.c.bf16 %v632_v33, %v629_v49  ;;  %5549 = vmatprep.subr.bf16.mxu1 %v6483_v0  ;;  %v650_v9 = vand.u32 4294901760, %v132_v23  ;;  %v699_v33 = vsub.f32 %v6885_v27, %v698_v37 }
  0xd8   :  { %5734 = vmatpush3.bf16.msra.mxu0 %v5733_v40  ;;  %v5742_v40 = vpack.c.bf16 %v6756_v8, %v6754_v7  ;;  %v644_v7 = vand.u32 4294901760, %v130_v45  ;;  %v6969_v49 = vsub.f32 %v132_v23, %v650_v9  ;;  %v700_v2 = vand.u32 4294901760, %v699_v33 }
  0xd9   :  { %5735 = vmatprep.subr.bf16.mxu0 %v6483_v0  ;;  %5551 = vmatpush3.bf16.msra.mxu1 %v6935_v48 }
  0xda   :  { %5552 = vmatprep.subr.bf16.mxu1 %v6483_v0  ;;  %v6952_v8 = vpack.c.bf16 %v644_v7, %v641_v17 }
  0xdc   :  { %5737 = vmatpush3.bf16.msra.mxu0 %v5736_v19  ;;  %v6942_v19 = vpack.c.bf16 %v638_v20, %v635_v10  ;;  %v5748_v20 = vpack.c.bf16 %v6793_v43, %v6791_v36  ;;  %v6962_v36 = vsub.f32 %v130_v45, %v644_v7  ;;  %v6965_v43 = vpack.c.bf16 %v650_v9, %v647_v25 }
  0xdd   :  { %5738 = vmatprep.subr.bf16.mxu0 %v6483_v0  ;;  %v712_v10 = vand.u32 4294901760, %v6899_v60  ;;  %v734_v9 = vsub.f32 %v6910_v28, %v8608_v18  ;;  %v8612_v18 = vand.u32 4294901760, %v6925_v52 }
  0xde   :  { %5554 = vmatpush3.bf16.msra.mxu1 %v6942_v19 }
  0xdf   :  { %5555 = vmatprep.subr.bf16.mxu1 %v6483_v0  ;;  %v735_v33 = vand.u32 4294901760, %v734_v9  ;;  %v8609_v9 = vand.u32 4294901760, %v6920_v5 }
  0xe0   :  { %5740 = vmatpush3.bf16.msra.mxu0 %v5739_v47  ;;  %v8614_v47 = vand.u32 4294901760, %v6901_v55 }
  0xe1   :  { %5741 = vmatprep.subr.bf16.mxu0 %v6483_v0 }
  0xe2   :  { %5557 = vmatpush3.bf16.msra.mxu1 %v6952_v8  ;;  %v720_v58 = vsub.f32 %v6901_v55, %v8614_v47  ;;  %v803_v47 = vand.u32 4294901760, %v6969_v49 }
  0xe3   :  { %5558 = vmatprep.subr.bf16.mxu1 %v6483_v0 }
  0xe4   :  { %5743 = vmatpush3.bf16.msra.mxu0 %v5742_v40  ;;  %v707_v40 = vand.u32 4294901760, %v706_v63  ;;  %v721_v7 = vand.u32 4294901760, %v720_v58  ;;  %v8607_v63 = vand.u32 4294901760, %v6912_v59 }
  0xe5   :  { %5744 = vmatprep.subr.bf16.mxu0 %v6483_v0 }
  0xe6   :  { %5560 = vmatpush3.bf16.msra.mxu1 %v6965_v43  ;;  %v6989_v45 = vpack.c.bf16 %v707_v40, %v700_v2  ;;  %v8606_v2 = vand.u32 4294901760, %v6916_v6 }
  0xe7   :  { %5561 = vmatprep.subr.bf16.mxu1 %v6483_v0 }
  0xe8   :  { %5746 = vmatpush3.bf16.msra.mxu0 %v5745_v57  ;;  %v713_v57 = vsub.f32 %v6899_v60, %v712_v10  ;;  %v748_v58 = vsub.f32 %v6916_v6, %v8606_v2  ;;  %v762_v2 = vsub.f32 %v6920_v5, %v8609_v9  ;;  %v776_v9 = vsub.f32 %v6925_v52, %v8612_v18 }
  0xe9   :  { %5747 = vmatprep.subr.bf16.mxu0 %v6483_v0 }
  0xea   :  { %v714_v17 = vand.u32 4294901760, %v713_v57  ;;  %v741_v57 = vsub.f32 %v6912_v59, %v8607_v63  ;;  %v8613_v63 = vand.u32 4294901760, %v6923_v1 }
  0xec   :  { %5749 = vmatpush3.bf16.msra.mxu0 %v5748_v20  ;;  %v8611_v20 = vand.u32 4294901760, %v6905_v24  ;;  %v6997_v23 = vpack.c.bf16 %v721_v7, %v714_v17  ;;  %v742_v17 = vand.u32 4294901760, %v741_v57  ;;  %v749_v7 = vand.u32 4294901760, %v748_v58 }
  0xed   :  { %5750 = vmatprep.subr.bf16.mxu0 %v6483_v0  ;;  %v763_v58 = vand.u32 4294901760, %v762_v2  ;;  %v777_v2 = vand.u32 4294901760, %v776_v9 }
  0xee   :  { %v727_v25 = vsub.f32 %v6905_v24, %v8611_v20  ;;  %v8615_v20 = vand.u32 4294901760, %v6962_v36 }
  0xf0   :  { %5752 = vmatpush3.bf16.msra.mxu0 %v5751_v21  ;;  %v728_v21 = vand.u32 4294901760, %v727_v25  ;;  %v8610_v25 = vand.u32 4294901760, %v6918_v31  ;;  %v790_v18 = vsub.f32 %v6962_v36, %v8615_v20  ;;  %v804_v20 = vsub.f32 %v6969_v49, %v803_v47 }
  0xf1   :  { %5753 = vmatprep.subr.bf16.mxu0 %v6483_v0 }
  0xf2   :  { %v7009_v40 = vpack.c.bf16 %v735_v33, %v728_v21  ;;  %v7021_v21 = vpack.c.bf16 %v749_v7, %v742_v17  ;;  %v755_v33 = vsub.f32 %v6918_v31, %v8610_v25  ;;  %v769_v7 = vsub.f32 %v6923_v1, %v8613_v63 }
  0xf3   :  { %5382 = vmatmul.mubr.f32.vlgmr.msra.gmra.mrb[2].mxu0 %v6796_v44  ;;  %v8616_v25 = vand.u32 4294901760, %v6960_v12  ;;  %v791_v9 = vand.u32 4294901760, %v790_v18  ;;  %v796_v63 = vand.u32 4294901760, %v6967_v30  ;;  %v805_v18 = vand.u32 4294901760, %v804_v20 }
  0xf4   :  { %5755 = vmatpush3.bf16.msra.mxu0 %v6710_v39  ;;  %5416 = vmatprep.mubr.msk.f32.mxu0 %vm6484_vm0, %v8769_v41  ;;  %v756_v57 = vand.u32 4294901760, %v755_v33  ;;  %v770_v33 = vand.u32 4294901760, %v769_v7  ;;  %v5592_v20 = vpack.c.bf16 %v6910_v28, %v6905_v24 }
  0xf5   :  { %5756 = vmatprep.subr.bf16.mxu0 %v6483_v0 }
  0xf6   :  { %v7033_v17 = vpack.c.bf16 %v763_v58, %v756_v57  ;;  %v7045_v57 = vpack.c.bf16 %v777_v2, %v770_v33  ;;  %v783_v58 = vsub.f32 %v6960_v12, %v8616_v25  ;;  %v797_v2 = vsub.f32 %v6967_v30, %v796_v63 }
  0xf8   :  { %5758 = vmatpush3.bf16.msra.mxu0 %v6727_v51  ;;  %v784_v7 = vand.u32 4294901760, %v783_v58  ;;  %v798_v58 = vand.u32 4294901760, %v797_v2  ;;  %v5595_v2 = vpack.c.bf16 %v6916_v6, %v6912_v59 }
  0xf9   :  { %5759 = vmatprep.subr.bf16.mxu0 %v6483_v0 }
  0xfa   :  { %v7057_v33 = vpack.c.bf16 %v791_v9, %v784_v7  ;;  %v7067_v25 = vpack.c.bf16 %v805_v18, %v798_v58  ;;  %v5586_v7 = vpack.c.bf16 %v6887_v11, %v6885_v27  ;;  %v5589_v9 = vpack.c.bf16 %v6901_v55, %v6899_v60 }
  0xfb   :  { %v5601_v58 = vpack.c.bf16 %v6925_v52, %v6923_v1  ;;  %v8774_v60 = vand.u32 4294901760, %v6910_v28 }
  0xfc   :  { %5761 = vmatpush3.bf16.msra.mxu0 %v6745_v61 }
  0xfd   :  { %5762 = vmatprep.subr.bf16.mxu0 %v6483_v0 }
 0x100   :  { %5764 = vmatpush3.bf16.msra.mxu0 %v6761_v15 }
 0x101   :  { %5765 = vmatprep.subr.bf16.mxu0 %v6483_v0 }
 0x104   :  { %5767 = vmatpush3.bf16.msra.mxu0 %v6782_v29 }
 0x105   :  { %5768 = vmatprep.subr.bf16.mxu0 %v6483_v0 }
 0x108   :  { %5770 = vmatpush3.bf16.msra.mxu0 %v6801_v53 }
 0x109   :  { %5771 = vmatprep.subr.bf16.mxu0 %v6483_v0 }
 0x10c   :  { %5773 = vmatpush3.bf16.msra.mxu0 %v6816_v16 }
 0x10d   :  { %5774 = vmatprep.subr.bf16.mxu0 %v6483_v0 }
 0x110   :  { %5776 = vmatpush3.bf16.msra.mxu0 %v6827_v42 }
 0x111   :  { %5777 = vmatprep.subr.bf16.mxu0 %v6483_v0 }
 0x113   :  { %5417 = vmatmul.mubr.f32.vlgmr.msra.gmra.mrb[2].mxu0 %v6811_v4 }
 0x114   :  { %5779 = vmatpush3.bf16.msra.mxu0 %v6718_v46  ;;  %5451 = vmatprep.mubr.msk.f32.mxu0 %vm6484_vm0, %v8769_v41  ;;  %v5598_v46 = vpack.c.bf16 %v6920_v5, %v6918_v31 }
 0x115   :  { %5780 = vmatprep.subr.bf16.mxu0 %v6483_v0 }
 0x118   :  { %5782 = vmatpush3.bf16.msra.mxu0 %v6736_v54  ;;  %v5604_v54 = vpack.c.bf16 %v6962_v36, %v6960_v12 }
 0x119   :  { %5783 = vmatprep.subr.bf16.mxu0 %v6483_v0 }
 0x11c   :  { %5785 = vmatpush3.bf16.msra.mxu0 %v6752_v3  ;;  %v5607_v3 = vpack.c.bf16 %v6969_v49, %v6967_v30  ;;  %v1265_v30 = vld [vmem:[%s8575_s3] sm:$0xff] }
 0x11d   :  { %5786 = vmatprep.subr.bf16.mxu0 %v6483_v0 }
 0x120   :  { %5788 = vmatpush3.bf16.msra.mxu0 %v6771_v22 }
 0x121   :  { %5789 = vmatprep.subr.bf16.mxu0 %v6483_v0 }
 0x124   :  { %5791 = vmatpush3.bf16.msra.mxu0 %v6789_v35 }
 0x125   :  { %5792 = vmatprep.subr.bf16.mxu0 %v6483_v0 }
 0x128   :  { %5794 = vmatpush3.bf16.msra.mxu0 %v6804_v62  ;;  %v8772_v62 = vand.u32 4294901760, %v6901_v55 }
 0x129   :  { %5795 = vmatprep.subr.bf16.mxu0 %v6483_v0 }
 0x12c   :  { %5797 = vmatpush3.bf16.msra.mxu0 %v6825_v34  ;;  %v2432_v34 = vld [vmem:[#allocation8 + $0x80] sm:$0xff] }
 0x12d   :  { %5798 = vmatprep.subr.bf16.mxu0 %v6483_v0  ;;  %v2504_v27 = vand.u32 4294901760, %v2432_v34 }
 0x130   :  { %5800 = vmatpush3.bf16.msra.mxu0 %v6841_v56  ;;  %v2416_v56 = vld [vmem:[#allocation8] sm:$0xff] }
 0x131   :  { %5801 = vmatprep.subr.bf16.mxu0 %v6483_v0 }
 0x133   :  { %5452 = vmatmul.mubr.f32.vlgmr.msra.gmra.mrb[2].mxu0 %v6777_v26 }
 0x134   :  { %5803 = vmatpush3.bf16.msra.mxu0 %v6710_v39  ;;  %5486 = vmatprep.mubr.msk.f32.mxu0 %vm6484_vm0, %v8769_v41 }
 0x135   :  { %5804 = vmatprep.subr.bf16.mxu0 %v6483_v0 }
 0x138   :  { %5806 = vmatpush3.bf16.msra.mxu0 %v6727_v51 }
 0x139   :  { %5807 = vmatprep.subr.bf16.mxu0 %v6483_v0 }
 0x13c   :  { %5809 = vmatpush3.bf16.msra.mxu0 %v6745_v61 }
 0x13d   :  { %5810 = vmatprep.subr.bf16.mxu0 %v6483_v0 }
 0x140   :  { %5812 = vmatpush3.bf16.msra.mxu0 %v6761_v15 }
 0x141   :  { %5813 = vmatprep.subr.bf16.mxu0 %v6483_v0 }
 0x144   :  { %5815 = vmatpush3.bf16.msra.mxu0 %v6782_v29 }
 0x145   :  { %5816 = vmatprep.subr.bf16.mxu0 %v6483_v0 }
 0x148   :  { %5818 = vmatpush3.bf16.msra.mxu0 %v6801_v53  ;;  %v5634_v53 = vpack.c.bf16 %v705_v38, %v698_v37  ;;  %v2417_v37 = vld [vmem:[#allocation8 + $0x8] sm:$0xff]  ;;  %v2456_v38 = vand.u32 4294901760, %v2416_v56 }
 0x149   :  { %5819 = vmatprep.subr.bf16.mxu0 %v6483_v0 }
 0x14c   :  { %5821 = vmatpush3.bf16.msra.mxu0 %v6816_v16  ;;  %v5637_v16 = vpack.c.bf16 %v8772_v62, %v712_v10  ;;  %v2459_v10 = vand.u32 4294901760, %v2417_v37 }
 0x14d   :  { %5822 = vmatprep.subr.bf16.mxu0 %v6483_v0 }
 0x150   :  { %5824 = vmatpush3.bf16.msra.mxu0 %v6827_v42  ;;  %v2433_v42 = vld [vmem:[#allocation8 + $0x88] sm:$0xff] }
 0x151   :  { %v2507_v11 = vand.u32 4294901760, %v2433_v42 }
 0x153   :  { %5487 = vmatmul.mubr.f32.vlgmr.msra.gmra.mrb[2].mxu0 %v6777_v26  ;;  %v7217_v18 = vsub.f32 %v2433_v42, %v2507_v11  ;;  %v2421_v42 = vld [vmem:[#allocation8 + $0x28] sm:$0xff] }
 0x166   :  { %v594_v39 = vpop.f32.mrb[0].mxu0 }
 0x167   :  { %v7126_v51 = vand.u32 4294901760, %v594_v39  ;;  %v5068_v61 = vpop.f32.mrb[1].mxu0 }
 0x168   :  { %v8776_v61 = vand.u32 4294901760, %v6916_v6  ;;  %v8777_v6 = vand.u32 4294901760, %v6918_v31 }
 0x169   :  { %v686_v15 = vsub.f32 %v594_v39, %v7126_v51  ;;  %v8775_v39 = vand.u32 4294901760, %v6912_v59  ;;  %v8778_v59 = vand.u32 4294901760, %v6920_v5  ;;  %v2422_v5 = vld [vmem:[#allocation8 + $0x30] sm:$0xff] }
 0x16b   :  { %v687_v22 = vand.u32 4294901760, %v686_v15 }
 0x16d   :  { %v688_v29 = vsub.f32 %v686_v15, %v687_v22 }
 0x16f   :  { %v689_v35 = vand.u32 4294901760, %v688_v29 }
 0x171   :  { %5102 = vmatmul.mubr.f32.vlgmr.msra.gmra.mrb[0].mxu1 %v689_v35  ;;  %v2436_v35 = vld [vmem:[#allocation8 + $0xa0] sm:$0xff] }
 0x172   :  { %5563 = vmatpush3.bf16.msra.mxu1 %v6989_v45  ;;  %5136 = vmatprep.mubr.msk.f32.mxu1 %vm6484_vm0, %v8769_v41  ;;  %v2434_v45 = vld [vmem:[#allocation8 + $0x90] sm:$0xff] }
 0x173   :  { %5564 = vmatprep.subr.bf16.mxu1 %v6483_v0 }
 0x176   :  { %5566 = vmatpush3.bf16.msra.mxu1 %v6997_v23  ;;  %v2435_v23 = vld [vmem:[#allocation8 + $0x98] sm:$0xff] }
 0x177   :  { %5567 = vmatprep.subr.bf16.mxu1 %v6483_v0 }
 0x17a   :  { %5569 = vmatpush3.bf16.msra.mxu1 %v7009_v40  ;;  %v8773_v40 = vand.u32 4294901760, %v6905_v24 }
 0x17b   :  { %5570 = vmatprep.subr.bf16.mxu1 %v6483_v0 }
 0x17c   :  { %v5640_v55 = vpack.c.bf16 %v8774_v60, %v8773_v40  ;;  %v2438_v40 = vld [vmem:[#allocation8 + $0xb0] sm:$0xff] }
 0x17e   :  { %5572 = vmatpush3.bf16.msra.mxu1 %v7021_v21  ;;  %v2513_v21 = vand.u32 4294901760, %v2435_v23 }
 0x17f   :  { %5573 = vmatprep.subr.bf16.mxu1 %v6483_v0 }
 0x180   :  { %v7226_v28 = vsub.f32 %v2435_v23, %v2513_v21  ;;  %v2516_v23 = vand.u32 4294901760, %v2436_v35 }
 0x182   :  { %5575 = vmatpush3.bf16.msra.mxu1 %v7033_v17  ;;  %v2418_v17 = vld [vmem:[#allocation8 + $0x10] sm:$0xff] }
 0x183   :  { %5576 = vmatprep.subr.bf16.mxu1 %v6483_v0 }
 0x186   :  { %5578 = vmatpush3.bf16.msra.mxu1 %v7045_v57  ;;  %v2419_v57 = vld [vmem:[#allocation8 + $0x18] sm:$0xff] }
 0x187   :  { %5579 = vmatprep.subr.bf16.mxu1 %v6483_v0 }
 0x18a   :  { %5581 = vmatpush3.bf16.msra.mxu1 %v7057_v33  ;;  %v7215_v33 = vsub.f32 %v2432_v34, %v2504_v27  ;;  %v2420_v34 = vld [vmem:[#allocation8 + $0x20] sm:$0xff] }
 0x18b   :  { %5582 = vmatprep.subr.bf16.mxu1 %v6483_v0  ;;  %v2468_v31 = vand.u32 4294901760, %v2420_v34 }
 0x18e   :  { %5584 = vmatpush3.bf16.msra.mxu1 %v7067_v25  ;;  %v2510_v25 = vand.u32 4294901760, %v2434_v45 }
 0x18f   :  { %5585 = vmatprep.subr.bf16.mxu1 %v6483_v0 }
 0x190   :  { %v7224_v24 = vsub.f32 %v2434_v45, %v2510_v25  ;;  %v7251_v45 = vpack.c.bf16 %v2507_v11, %v2504_v27  ;;  %v2522_v27 = vand.u32 4294901760, %v2438_v40  ;;  %v8779_v11 = vand.u32 4294901760, %v6923_v1 }
 0x191   :  { %5137 = vmatmul.mubr.f32.vlgmr.msra.gmra.mrb[0].mxu1 %v7126_v51  ;;  %v2474_v1 = vand.u32 4294901760, %v2422_v5 }
 0x192   :  { %5587 = vmatpush3.bf16.msra.mxu1 %v5586_v7  ;;  %5171 = vmatprep.mubr.msk.f32.mxu1 %vm6484_vm0, %v8769_v41  ;;  %v7219_v7 = vsub.f32 %v2416_v56, %v2456_v38  ;;  %v5646_v56 = vpack.c.bf16 %v8778_v59, %v8777_v6 }
 0x193   :  { %5588 = vmatprep.subr.bf16.mxu1 %v6483_v0  ;;  %5826 = vmatprep.subr.bf16.mxu0 %v7251_v45 }
 0x196   :  { %5590 = vmatpush3.bf16.msra.mxu1 %v5589_v9  ;;  %v2462_v9 = vand.u32 4294901760, %v2418_v17 }
 0x197   :  { %5591 = vmatprep.subr.bf16.mxu1 %v6483_v0 }
 0x19a   :  { %5593 = vmatpush3.bf16.msra.mxu1 %v5592_v20  ;;  %v7222_v20 = vsub.f32 %v2417_v37, %v2459_v10 }
 0x19b   :  { %5594 = vmatprep.subr.bf16.mxu1 %v6483_v0 }
 0x19e   :  { %5596 = vmatpush3.bf16.msra.mxu1 %v5595_v2  ;;  %v2465_v2 = vand.u32 4294901760, %v2419_v57 }
 0x19f   :  { %5597 = vmatprep.subr.bf16.mxu1 %v6483_v0 }
 0x1a2   :  { %5599 = vmatpush3.bf16.msra.mxu1 %v5598_v46  ;;  %v8624_v46 = vand.u32 4294901760, %v7215_v33 }
 0x1a3   :  { %5600 = vmatprep.subr.bf16.mxu1 %v6483_v0 }
 0x1a6   :  { %5602 = vmatpush3.bf16.msra.mxu1 %v5601_v58  ;;  %v8623_v58 = vand.u32 4294901760, %v7217_v18 }
 0x1a7   :  { %5603 = vmatprep.subr.bf16.mxu1 %v6483_v0 }
 0x1a8   :  { %v2690_v29 = vsub.f32 %v7217_v18, %v8623_v58 }
 0x1aa   :  { %5605 = vmatpush3.bf16.msra.mxu1 %v5604_v54  ;;  %v7230_v54 = vsub.f32 %v2418_v17, %v2462_v9  ;;  %v2691_v62 = vand.u32 4294901760, %v2690_v29  ;;  %v7255_v17 = vsub.f32 %v2436_v35, %v2516_v23  ;;  %v7268_v35 = vsub.f32 %v2420_v34, %v2468_v31 }
 0x1ab   :  { %5606 = vmatprep.subr.bf16.mxu1 %v6483_v0  ;;  %v8785_v34 = vand.u32 4294901760, %v6960_v12 }
 0x1ae   :  { %5608 = vmatpush3.bf16.msra.mxu1 %v5607_v3  ;;  %v7232_v3 = vsub.f32 %v2419_v57, %v2465_v2  ;;  %v7257_v57 = vpack.c.bf16 %v2459_v10, %v2456_v38 }
 0x1af   :  { %5609 = vmatprep.subr.bf16.mxu1 %v6483_v0 }
 0x1b0   :  { %5828 = vmatpush3.bf16.msra.mxu0 %v7257_v57 }
 0x1b1   :  { %5172 = vmatmul.mubr.f32.vlgmr.msra.gmra.mrb[0].mxu1 %v686_v15  ;;  %v5643_v15 = vpack.c.bf16 %v8776_v61, %v8775_v39  ;;  %v2471_v39 = vand.u32 4294901760, %v2421_v42 }
 0x1b2   :  { %5611 = vmatpush3.bf16.msra.mxu1 %v6883_v50  ;;  %5206 = vmatprep.mubr.msk.f32.mxu1 %vm6484_vm0, %v8769_v41 }
 0x1b3   :  { %5612 = vmatprep.subr.bf16.mxu1 %v6483_v0  ;;  %v7270_v38 = vsub.f32 %v2421_v42, %v2471_v39  ;;  %v8786_v42 = vand.u32 4294901760, %v6962_v36  ;;  %v7298_v12 = vpack.c.bf16 %v2471_v39, %v2468_v31 }
 0x1b5   :  { %8781 = vst [vmem:[#allocation35_spill] sm:$0xff] %v7270_v38  ;;  %v5652_v6 = vpack.c.bf16 %v8786_v42, %v8785_v34 }
 0x1b6   :  { %5614 = vmatpush3.bf16.msra.mxu1 %v6897_v14 }
 0x1b7   :  { %5615 = vmatprep.subr.bf16.mxu1 %v6483_v0 }
 0x1ba   :  { %5617 = vmatpush3.bf16.msra.mxu1 %v6908_v13 }
 0x1bb   :  { %5618 = vmatprep.subr.bf16.mxu1 %v6483_v0 }
 0x1be   :  { %5620 = vmatpush3.bf16.msra.mxu1 %v6928_v32 }
 0x1bf   :  { %5621 = vmatprep.subr.bf16.mxu1 %v6483_v0 }
 0x1c2   :  { %5623 = vmatpush3.bf16.msra.mxu1 %v6935_v48 }
 0x1c3   :  { %5624 = vmatprep.subr.bf16.mxu1 %v6483_v0 }
 0x1c6   :  { %5626 = vmatpush3.bf16.msra.mxu1 %v6942_v19 }
 0x1c7   :  { %5627 = vmatprep.subr.bf16.mxu1 %v6483_v0 }
 0x1ca   :  { %5629 = vmatpush3.bf16.msra.mxu1 %v6952_v8 }
 0x1cb   :  { %5630 = vmatprep.subr.bf16.mxu1 %v6483_v0 }
 0x1ce   :  { %5632 = vmatpush3.bf16.msra.mxu1 %v6965_v43 }
 0x1cf   :  { %5633 = vmatprep.subr.bf16.mxu1 %v6483_v0 }
 0x1d1   :  { %5207 = vmatmul.mubr.f32.vlgmr.msra.gmra.mrb[0].mxu1 %v687_v22  ;;  %v2683_v22 = vsub.f32 %v7215_v33, %v8624_v46 }
 0x1d2   :  { %5635 = vmatpush3.bf16.msra.mxu1 %v5634_v53  ;;  %5241 = vmatprep.mubr.msk.f32.mxu1 %vm6484_vm0, %v8769_v41 }
 0x1d3   :  { %5636 = vmatprep.subr.bf16.mxu1 %v6483_v0  ;;  %v2684_v53 = vand.u32 4294901760, %v2683_v22  ;;  %v8780_v22 = vand.u32 4294901760, %v6925_v52 }
 0x1d5   :  { %v7249_v37 = vpack.c.bf16 %v2691_v62, %v2684_v53  ;;  %v5649_v29 = vpack.c.bf16 %v8780_v22, %v8779_v11  ;;  %v2423_v53 = vld [vmem:[#allocation8 + $0x38] sm:$0xff]  ;;  %v8620_v11 = vand.u32 4294901760, %v7224_v24  ;;  %v8619_v22 = vand.u32 4294901760, %v7226_v28 }
 0x1d6   :  { %5638 = vmatpush3.bf16.msra.mxu1 %v5637_v16  ;;  %v2437_v16 = vld [vmem:[#allocation8 + $0xa8] sm:$0xff]  ;;  %v2477_v52 = vand.u32 4294901760, %v2423_v53 }
 0x1d7   :  { %5639 = vmatprep.subr.bf16.mxu1 %v6483_v0  ;;  %v2519_v60 = vand.u32 4294901760, %v2437_v16  ;;  %v2704_v34 = vsub.f32 %v7226_v28, %v8619_v22 }
 0x1d8   :  { %v7288_v59 = vsub.f32 %v2423_v53, %v2477_v52 }
 0x1d9   :  { %v7259_v61 = vsub.f32 %v2437_v16, %v2519_v60  ;;  %v7280_v16 = vsub.f32 %v2422_v5, %v2474_v1  ;;  %v8622_v5 = vand.u32 4294901760, %v7219_v7 }
 0x1da   :  { %5641 = vmatpush3.bf16.msra.mxu1 %v5640_v55  ;;  %v2439_v55 = vld [vmem:[#allocation8 + $0xb8] sm:$0xff]  ;;  %8787 = vst [vmem:[#allocation39_spill] sm:$0xff] %v7288_v59  ;;  %v8640_v46 = vand.u32 4294901760, %v7288_v59 }
 0x1db   :  { %5642 = vmatprep.subr.bf16.mxu1 %v6483_v0  ;;  %v2525_v10 = vand.u32 4294901760, %v2439_v55  ;;  %8784 = vst [vmem:[#allocation38_spill] sm:$0xff] %v7280_v16  ;;  %v2571_v53 = vsub.f32 %v7219_v7, %v8622_v5  ;;  %v8638_v58 = vand.u32 4294901760, %v7280_v16 }
 0x1dd   :  { %v7278_v62 = vsub.f32 %v2439_v55, %v2525_v10  ;;  %v7301_v36 = vpack.c.bf16 %v2525_v10, %v2522_v27  ;;  %v8617_v10 = vand.u32 4294901760, %v7232_v3 }
 0x1de   :  { %5644 = vmatpush3.bf16.msra.mxu1 %v5643_v15  ;;  %v7261_v15 = vpack.c.bf16 %v2513_v21, %v2510_v25  ;;  %v7274_v25 = vsub.f32 %v2438_v40, %v2522_v27  ;;  %v7276_v21 = vpack.c.bf16 %v2465_v2, %v2462_v9  ;;  %v7290_v9 = vpack.c.bf16 %v2519_v60, %v2516_v23 }
 0x1df   :  { %5645 = vmatprep.subr.bf16.mxu1 %v6483_v0  ;;  %8783 = vst [vmem:[#allocation37_spill] sm:$0xff] %v7278_v62  ;;  %v5655_v2 = vpack.c.bf16 %v803_v47, %v796_v63  ;;  %v8621_v27 = vand.u32 4294901760, %v7222_v20  ;;  %v8636_v5 = vand.u32 4294901760, %v7278_v62 }
 0x1e0   :  { %5830 = vmatprep.subr.bf16.mxu0 %v7261_v15  ;;  %8782 = vst [vmem:[#allocation36_spill] sm:$0xff] %v7274_v25 }
 0x1e1   :  { %5832 = vmatpush3.bf16.msra.mxu0 %v7276_v21 }
 0x1e2   :  { %5647 = vmatpush3.bf16.msra.mxu1 %v5646_v56  ;;  %5834 = vmatprep.subr.bf16.mxu0 %v7290_v9  ;;  %v7305_v56 = vpack.c.bf16 %v2477_v52, %v2474_v1  ;;  %v2578_v1 = vsub.f32 %v7222_v20, %v8621_v27  ;;  %v2697_v52 = vsub.f32 %v7224_v24, %v8620_v11 }
 0x1e3   :  { %5648 = vmatprep.subr.bf16.mxu1 %v6483_v0 }
 0x1e5   :  { %5836 = vmatpush3.bf16.msra.mxu0 %v7298_v12 }
 0x1e6   :  { %5650 = vmatpush3.bf16.msra.mxu1 %v5649_v29  ;;  %5838 = vmatprep.subr.bf16.mxu0 %v7301_v36  ;;  %v8618_v29 = vand.u32 4294901760, %v7230_v54 }
 0x1e7   :  { %5651 = vmatprep.subr.bf16.mxu1 %v6483_v0 }
 0x1e8   :  { %v2585_v42 = vsub.f32 %v7230_v54, %v8618_v29 }
 0x1e9   :  { %5840 = vmatpush3.bf16.msra.mxu0 %v7305_v56 }
 0x1ea   :  { %5653 = vmatpush3.bf16.msra.mxu1 %v5652_v6  ;;  %v2592_v6 = vsub.f32 %v7232_v3, %v8617_v10 }
 0x1eb   :  { %5654 = vmatprep.subr.bf16.mxu1 %v6483_v0 }
 0x1ee   :  { %5656 = vmatpush3.bf16.msra.mxu1 %v5655_v2  ;;  %v7374_v2 = vld [vmem:[#allocation8 + $0xc0] sm:$0xff] }
 0x1ef   :  { %5657 = vmatprep.subr.bf16.mxu1 %v6483_v0 }
 0x1f1   :  { %5242 = vmatmul.mubr.f32.vlgmr.msra.gmra.mrb[0].mxu1 %v7126_v51 }
 0x1f2   :  { %5659 = vmatpush3.bf16.msra.mxu1 %v6883_v50  ;;  %5276 = vmatprep.mubr.msk.f32.mxu1 %vm6484_vm0, %v8769_v41  ;;  %v1916_v50 = vsel %vm1914_vm2, %v1265_v30, 0  ;;  %v7376_v30 = vld [vmem:[#allocation8 + $0xc8] sm:$0xff] }
 0x1f3   :  { %5660 = vmatprep.subr.bf16.mxu1 %v6483_v0  ;;  %v7322_v41 = vand.u32 4294901760, %v1916_v50 }
 0x1f6   :  { %5662 = vmatpush3.bf16.msra.mxu1 %v6897_v14  ;;  %v1988_v14 = vsub.f32 %v1916_v50, %v7322_v41  ;;  %v7378_v50 = vld [vmem:[#allocation8 + $0x40] sm:$0xff] }
 0x1f7   :  { %5663 = vmatprep.subr.bf16.mxu1 %v6483_v0 }
 0x1f8   :  { %v1989_v49 = vand.u32 4294901760, %v1988_v14 }
 0x1fa   :  { %5665 = vmatpush3.bf16.msra.mxu1 %v6908_v13  ;;  %v1990_v13 = vsub.f32 %v1988_v14, %v1989_v49 }
 0x1fb   :  { %5666 = vmatprep.subr.bf16.mxu1 %v6483_v0 }
 0x1fe   :  { %5668 = vmatpush3.bf16.msra.mxu1 %v6928_v32  ;;  %v1991_v32 = vand.u32 4294901760, %v1990_v13  ;;  %v7385_v13 = vld [vmem:[#allocation8 + $0xd8] sm:$0xff] }
 0x1ff   :  { %5669 = vmatprep.subr.bf16.mxu1 %v6483_v0 }
 0x202   :  { %5671 = vmatpush3.bf16.msra.mxu1 %v6935_v48  ;;  %v1266_v48 = vld [vmem:[%s8575_s3 + $0x8] sm:$0xff] }
 0x203   :  { %5672 = vmatprep.subr.bf16.mxu1 %v6483_v0 }
 0x206   :  { %5674 = vmatpush3.bf16.msra.mxu1 %v6942_v19  ;;  %v1919_v19 = vsel %vm1914_vm2, %v1266_v48, 0  ;;  %v2579_v48 = vand.u32 4294901760, %v2578_v1  ;;  %v8629_v1 = vand.u32 4294901760, %v7259_v61 }
 0x207   :  { %5675 = vmatprep.subr.bf16.mxu1 %v6483_v0  ;;  %v7338_v47 = vand.u32 4294901760, %v1919_v19 }
 0x209   :  { %v1998_v63 = vsub.f32 %v1919_v19, %v7338_v47  ;;  %v2698_v19 = vand.u32 4294901760, %v2697_v52  ;;  %v7396_v52 = vld [vmem:[#allocation8 + $0x50] sm:$0xff] }
 0x20a   :  { %5677 = vmatpush3.bf16.msra.mxu1 %v6952_v8  ;;  %v8635_v22 = vand.u32 4294901760, %v7396_v52 }
 0x20b   :  { %5678 = vmatprep.subr.bf16.mxu1 %v6483_v0  ;;  %v1999_v8 = vand.u32 4294901760, %v1998_v63 }
 0x20d   :  { %v2000_v23 = vsub.f32 %v1998_v63, %v1999_v8 }
 0x20e   :  { %5680 = vmatpush3.bf16.msra.mxu1 %v6965_v43 }
 0x20f   :  { %v2001_v60 = vand.u32 4294901760, %v2000_v23  ;;  %v2593_v23 = vand.u32 4294901760, %v2592_v6 }
 0x211   :  { %5277 = vmatmul.mubr.f32.vlgmr.msra.gmra.mrb[0].mxu1 %v7126_v51 }
 0x212   :  { %5491 = vmatprep.mubr.f32.mxu1 %v1991_v32  ;;  %v2572_v32 = vand.u32 4294901760, %v2571_v53  ;;  %v8627_v53 = vand.u32 4294901760, %v7255_v17 }
 0x214   :  { %v2711_v27 = vsub.f32 %v7255_v17, %v8627_v53 }
 0x226   :  { %v1904_v40 = vpop.f32.mrb[2].mxu0 }
 0x227   :  { %v7341_v0 = vand.u32 4294901760, %v1904_v40  ;;  %v5488_v43 = vpop.f32.mrb[3].mxu0 }
 0x228   :  { %v8631_v43 = vand.u32 4294901760, %v7376_v30 }
 0x229   :  { %v2009_v51 = vsub.f32 %v1904_v40, %v7341_v0  ;;  %5489 = vmatprep.subr.mxu1 %v7341_v0  ;;  %v8632_v40 = vand.u32 4294901760, %v7374_v2 }
 0x22a   :  { %5490 = vmatpush3.msra.mxu1 %v7341_v0  ;;  %v7408_v29 = vsub.f32 %v7376_v30, %v8631_v43 }
 0x22b   :  { %5492 = vmatmul.mubr.f32.vlgmr.msra.gmra.mrb[2].mxu1 %v2001_v60  ;;  %v2010_v55 = vand.u32 4294901760, %v2009_v51  ;;  %v8630_v60 = vand.u32 4294901760, %v7378_v50  ;;  %v7403_v10 = vsub.f32 %v7374_v2, %v8632_v40  ;;  %v7463_v40 = vsub.f32 %v7396_v52, %v8635_v22 }
 0x22c   :  { %5496 = vmatprep.mubr.f32.mxu1 %v7322_v41  ;;  %8789 = vst [vmem:[#allocation41_spill] sm:$0xff] %v7408_v29  ;;  %v2613_v22 = vsub.f32 %v7280_v16, %v8638_v58 }
 0x22d   :  { %v2011_v31 = vsub.f32 %v2009_v51, %v2010_v55  ;;  %8788 = vst [vmem:[#allocation40_spill] sm:$0xff] %v7403_v10  ;;  %8794 = vst [vmem:[#allocation46_spill] sm:$0xff] %v7463_v40 }
 0x22f   :  { %v2012_v39 = vand.u32 4294901760, %v2011_v31  ;;  %v8625_v31 = vand.u32 4294901760, %v7385_v13 }
 0x231   :  { %5494 = vmatprep.subr.mxu1 %v2012_v39 }
 0x232   :  { %5495 = vmatpush3.msra.mxu1 %v2012_v39  ;;  %v5859_v39 = vpack.c.bf16 %v2579_v48, %v2572_v32  ;;  %v7414_v32 = vsub.f32 %v7378_v50, %v8630_v60 }
 0x233   :  { %5497 = vmatmul.mubr.f32.vlgmr.msra.gmra.mrb[2].mxu1 %v7338_v47  ;;  %5499 = vmatprep.subr.mxu1 %v2009_v51 }
 0x234   :  { %5500 = vmatpush3.msra.mxu1 %v2009_v51  ;;  %5501 = vmatprep.mubr.f32.mxu1 %v1988_v14  ;;  %v7381_v14 = vld [vmem:[#allocation8 + $0x48] sm:$0xff]  ;;  %8790 = vst [vmem:[#allocation42_spill] sm:$0xff] %v7414_v32 }
 0x235   :  { %5504 = vmatprep.subr.mxu1 %v7341_v0  ;;  %v8628_v51 = vand.u32 4294901760, %v7381_v14 }
 0x237   :  { %v7419_v48 = vsub.f32 %v7381_v14, %v8628_v51  ;;  %v2712_v51 = vand.u32 4294901760, %v2711_v27 }
 0x239   :  { %8791 = vst [vmem:[#allocation43_spill] sm:$0xff] %v7419_v48  ;;  %v8797_v58 = vand.u32 4294901760, %v7419_v48 }
 0x23b   :  { %5502 = vmatmul.mubr.f32.vlgmr.msra.gmra.mrb[2].mxu1 %v1998_v63  ;;  %v2705_v63 = vand.u32 4294901760, %v2704_v34  ;;  %v7398_v34 = vld [vmem:[#allocation8 + $0x58] sm:$0xff] }
 0x23c   :  { %5505 = vmatpush3.msra.mxu1 %v7341_v0  ;;  %5506 = vmatprep.mubr.f32.mxu1 %v1989_v49  ;;  %v7383_v49 = vld [vmem:[#allocation8 + $0xd0] sm:$0xff]  ;;  %v8639_v11 = vand.u32 4294901760, %v7398_v34 }
 0x23d   :  { %5509 = vmatprep.subr.mxu1 %v2010_v55 }
 0x23e   :  { %v7468_v53 = vsub.f32 %v7398_v34, %v8639_v11  ;;  %v2634_v11 = vsub.f32 %v7419_v48, %v8797_v58  ;;  %v2614_v58 = vand.u32 4294901760, %v2613_v22  ;;  %v7511_v22 = vld [vmem:[#allocation8 + $0xe8] sm:$0xff] }
 0x240   :  { %8795 = vst [vmem:[#allocation47_spill] sm:$0xff] %v7468_v53 }
 0x243   :  { %5507 = vmatmul.mubr.f32.vlgmr.msra.gmra.mrb[2].mxu1 %v1999_v8  ;;  %v2586_v8 = vand.u32 4294901760, %v2585_v42  ;;  %v5861_v42 = vpack.c.bf16 %v2705_v63, %v2698_v19  ;;  %v7429_v63 = vsub.f32 %v7385_v13, %v8625_v31  ;;  %v8642_v31 = vand.u32 4294901760, %v7403_v10 }
 0x244   :  { %5510 = vmatpush3.msra.mxu1 %v2010_v55  ;;  %5511 = vmatprep.mubr.f32.mxu1 %v7322_v41  ;;  %v8626_v55 = vand.u32 4294901760, %v7383_v49 }
 0x245   :  { %5514 = vmatprep.subr.mxu1 %v7341_v0  ;;  %v5863_v6 = vpack.c.bf16 %v2593_v23, %v2586_v8  ;;  %8793 = vst [vmem:[#allocation45_spill] sm:$0xff] %v7429_v63  ;;  %v8633_v8 = vand.u32 4294901760, %v7268_v35  ;;  %v8634_v23 = vand.u32 4294901760, %v7270_v38  ;;  %v2739_v27 = vsub.f32 %v7403_v10, %v8642_v31 }
 0x246   :  { %v7424_v19 = vsub.f32 %v7383_v49, %v8626_v55  ;;  %v2620_v55 = vsub.f32 %v7288_v59, %v8640_v46  ;;  %v8799_v31 = vand.u32 4294901760, %v7429_v63  ;;  %v8665_v10 = vand.u32 4294901760, %v7468_v53 }
 0x247   :  { %v2599_v60 = vsub.f32 %v7268_v35, %v8633_v8  ;;  %v2606_v43 = vsub.f32 %v7270_v38, %v8634_v23  ;;  %v2732_v23 = vsub.f32 %v7278_v62, %v8636_v5  ;;  %v8796_v5 = vand.u32 4294901760, %v7414_v32 }
 0x248   :  { %8792 = vst [vmem:[#allocation44_spill] sm:$0xff] %v7424_v19  ;;  %v8798_v46 = vand.u32 4294901760, %v7424_v19  ;;  %v2760_v4 = vsub.f32 %v7429_v63, %v8799_v31  ;;  %v2621_v48 = vand.u32 4294901760, %v2620_v55  ;;  %v2740_v16 = vand.u32 4294901760, %v2739_v27 }
 0x249   :  { %v2733_v59 = vand.u32 4294901760, %v2732_v23  ;;  %v8800_v63 = vand.u32 4294901760, %v7374_v2 }
 0x24a   :  { %v2753_v44 = vsub.f32 %v7424_v19, %v8798_v46  ;;  %v2635_v19 = vand.u32 4294901760, %v2634_v11  ;;  %v2761_v38 = vand.u32 4294901760, %v2760_v4  ;;  %v7515_v4 = vld [vmem:[#allocation8 + $0x60] sm:$0xff] }
 0x24b   :  { %5512 = vmatmul.mubr.f32.vlgmr.msra.gmra.mrb[2].mxu1 %v7338_v47 }
 0x24c   :  { %5515 = vmatpush3.msra.mxu1 %v7341_v0  ;;  %5516 = vmatprep.mubr.f32.mxu1 %v7322_v41  ;;  %v2718_v0 = vsub.f32 %v7259_v61, %v8629_v1  ;;  %v8637_v41 = vand.u32 4294901760, %v7274_v25 }
 0x24d   :  { %5858 = vmatprep.subr.bf16.mxu1 %v7249_v37  ;;  %v8644_v37 = vand.u32 4294901760, %v7408_v29 }
 0x24e   :  { %v2719_v1 = vand.u32 4294901760, %v2718_v0  ;;  %v2725_v8 = vsub.f32 %v7274_v25, %v8637_v41  ;;  %v2627_v41 = vsub.f32 %v7414_v32, %v8796_v5  ;;  %v2754_v25 = vand.u32 4294901760, %v2753_v44 }
 0x24f   :  { %v2746_v0 = vsub.f32 %v7408_v29, %v8644_v37  ;;  %v2600_v37 = vand.u32 4294901760, %v2599_v60  ;;  %v2607_v29 = vand.u32 4294901760, %v2606_v43  ;;  %v2648_v60 = vsub.f32 %v7468_v53, %v8665_v10 }
 0x250   :  { %v5865_v5 = vpack.c.bf16 %v2719_v1, %v2712_v51  ;;  %v2726_v32 = vand.u32 4294901760, %v2725_v8  ;;  %v2628_v46 = vand.u32 4294901760, %v2627_v41  ;;  %v7509_v51 = vld [vmem:[#allocation8 + $0xe0] sm:$0xff]  ;;  %v8669_v44 = vand.u32 4294901760, %v7511_v22 }
 0x251   :  { %v2747_v62 = vand.u32 4294901760, %v2746_v0  ;;  %v5867_v31 = vpack.c.bf16 %v2607_v29, %v2600_v37  ;;  %v8670_v11 = vand.u32 4294901760, %v7509_v51  ;;  %v7517_v29 = vld [vmem:[#allocation8 + $0x68] sm:$0xff]  ;;  %v5877_v23 = vpack.c.bf16 %v2761_v38, %v2754_v25  ;;  %v7541_v25 = vld [vmem:[#allocation8 + $0xf0] sm:$0xff] }
 0x252   :  { %v5869_v55 = vpack.c.bf16 %v2733_v59, %v2726_v32  ;;  %v5875_v8 = vpack.c.bf16 %v2635_v19, %v2628_v46  ;;  %v7529_v32 = vsub.f32 %v7511_v22, %v8669_v44  ;;  %v2546_v27 = vand.u32 4294901760, %v7541_v25 }
 0x253   :  { %5517 = vmatmul.mubr.f32.vlgmr.msra.gmra.mrb[2].mxu1 %v7338_v47  ;;  %v8666_v47 = vand.u32 4294901760, %v7463_v40  ;;  %v5873_v1 = vpack.c.bf16 %v2747_v62, %v2740_v16  ;;  %v7524_v59 = vsub.f32 %v7509_v51, %v8670_v11  ;;  %v2447_v16 = vld [vmem:[#allocation8 + $0xf8] sm:$0xff] }
 0x254   :  { %5860 = vmatpush3.bf16.msra.mxu1 %v5859_v39  ;;  %v5871_v39 = vpack.c.bf16 %v2621_v48, %v2614_v58  ;;  %v2649_v48 = vand.u32 4294901760, %v2648_v60  ;;  %v8672_v37 = vand.u32 4294901760, %v7529_v32  ;;  %v2549_v0 = vand.u32 4294901760, %v2447_v16  ;;  %v2431_v58 = vld [vmem:[#allocation8 + $0x78] sm:$0xff] }
 0x255   :  { %5862 = vmatprep.subr.bf16.mxu1 %v5861_v42  ;;  %v2641_v43 = vsub.f32 %v7463_v40, %v8666_v47  ;;  %v8668_v42 = vand.u32 4294901760, %v7515_v4  ;;  %v8671_v19 = vand.u32 4294901760, %v7524_v59  ;;  %v2501_v60 = vand.u32 4294901760, %v2431_v58 }
 0x256   :  { %v7555_v47 = vsub.f32 %v7541_v25, %v2546_v27 }
 0x257   :  { %v2642_v41 = vand.u32 4294901760, %v2641_v43  ;;  %v7534_v62 = vsub.f32 %v7515_v4, %v8668_v42  ;;  %v2767_v10 = vsub.f32 %v7524_v59, %v8671_v19  ;;  %v7567_v19 = vsub.f32 %v2431_v58, %v2501_v60 }
 0x258   :  { %5864 = vmatpush3.bf16.msra.mxu1 %v5863_v6  ;;  %v8667_v6 = vand.u32 4294901760, %v7517_v29  ;;  %v8684_v25 = vand.u32 4294901760, %v7555_v47 }
 0x259   :  { %5866 = vmatprep.subr.bf16.mxu1 %v5865_v5  ;;  %v2430_v5 = vld [vmem:[#allocation8 + $0x70] sm:$0xff]  ;;  %v8677_v46 = vand.u32 4294901760, %v7534_v62 }
 0x25a   :  { %v7539_v38 = vsub.f32 %v7517_v29, %v8667_v6  ;;  %v2498_v43 = vand.u32 4294901760, %v2430_v5  ;;  %v7557_v6 = vsub.f32 %v2447_v16, %v2549_v0 }
 0x25b   :  { %v2655_v42 = vsub.f32 %v7534_v62, %v8677_v46  ;;  %v8681_v46 = vand.u32 4294901760, %v7567_v19 }
 0x25c   :  { %5868 = vmatpush3.bf16.msra.mxu1 %v5867_v31  ;;  %v8680_v31 = vand.u32 4294901760, %v7539_v38  ;;  %v7565_v11 = vsub.f32 %v2430_v5, %v2498_v43  ;;  %v8683_v16 = vand.u32 4294901760, %v7557_v6 }
 0x25d   :  { %5870 = vmatprep.subr.bf16.mxu1 %v5869_v55  ;;  %v2774_v55 = vsub.f32 %v7529_v32, %v8672_v37  ;;  %v2768_v37 = vand.u32 4294901760, %v2767_v10  ;;  %v2656_v58 = vand.u32 4294901760, %v2655_v42  ;;  %v2781_v10 = vsub.f32 %v7555_v47, %v8684_v25 }
 0x25e   :  { %v2662_v44 = vsub.f32 %v7539_v38, %v8680_v31  ;;  %v8682_v40 = vand.u32 4294901760, %v7565_v11  ;;  %v8801_v31 = vand.u32 4294901760, %v7376_v30 }
 0x25f   :  { %v2775_v53 = vand.u32 4294901760, %v2774_v55 }
 0x260   :  { %5872 = vmatpush3.bf16.msra.mxu1 %v5871_v39  ;;  %v5879_v39 = vpack.c.bf16 %v2649_v48, %v2642_v41  ;;  %v7577_v5 = vpack.c.bf16 %v8801_v31, %v8800_v63  ;;  %v8802_v41 = vand.u32 4294901760, %v7378_v50  ;;  %v8803_v48 = vand.u32 4294901760, %v7381_v14 }
 0x261   :  { %5874 = vmatprep.subr.bf16.mxu1 %v5873_v1  ;;  %v2788_v1 = vsub.f32 %v7557_v6, %v8683_v16  ;;  %v2663_v2 = vand.u32 4294901760, %v2662_v44  ;;  %v2669_v30 = vsub.f32 %v7565_v11, %v8682_v40  ;;  %v2676_v63 = vsub.f32 %v7567_v19, %v8681_v46  ;;  %v8833_v16 = vld [vmem:[#allocation42_spill] sm:$0xff] }
 0x262   :  { %v7589_v55 = vpack.c.bf16 %v8803_v48, %v8802_v41  ;;  %5842 = vmatprep.subr.bf16.mxu0 %v7577_v5  ;;  %v5881_v42 = vpack.c.bf16 %v2775_v53, %v2768_v37  ;;  %v8805_v50 = vand.u32 4294901760, %v7383_v49  ;;  %v8806_v14 = vand.u32 4294901760, %v7385_v13 }
 0x263   :  { %v2789_v31 = vand.u32 4294901760, %v2788_v1  ;;  %v5883_v41 = vpack.c.bf16 %v2663_v2, %v2656_v58  ;;  %v8808_v48 = vand.u32 4294901760, %v7396_v52  ;;  %v8809_v46 = vand.u32 4294901760, %v7398_v34 }
 0x264   :  { %5876 = vmatpush3.bf16.msra.mxu1 %v5875_v8  ;;  %8804 = vst [vmem:[#allocation48_spill] sm:$0xff] %v7589_v55  ;;  %v2782_v8 = vand.u32 4294901760, %v2781_v10  ;;  %5844 = vmatpush3.bf16.msra.mxu0 %v7589_v55  ;;  %v7603_v44 = vpack.c.bf16 %v8806_v14, %v8805_v50  ;;  %v2670_v40 = vand.u32 4294901760, %v2669_v30  ;;  %v2677_v53 = vand.u32 4294901760, %v2676_v63 }
 0x265   :  { %5878 = vmatprep.subr.bf16.mxu1 %v5877_v23  ;;  %v7609_v23 = vpack.c.bf16 %v8809_v46, %v8808_v48  ;;  %v8811_v49 = vand.u32 4294901760, %v7509_v51  ;;  %v8812_v13 = vand.u32 4294901760, %v7511_v22  ;;  %v8814_v34 = vand.u32 4294901760, %v7515_v4  ;;  %v8818_v48 = vld [vmem:[#allocation34_spill] sm:$0xff]  ;;  %v7710_v4 = vld [vmem:[#allocation10 + $0xf8] sm:$0xff]  ;;  %v7712_v22 = vld [vmem:[#allocation10 + $0x70] sm:$0xff] }
 0x266   :  { %8807 = vst [vmem:[#allocation49_spill] sm:$0xff] %v7603_v44  ;;  %5846 = vmatprep.subr.bf16.mxu0 %v7603_v44  ;;  %v5885_v37 = vpack.c.bf16 %v2789_v31, %v2782_v8  ;;  %v5887_v52 = vpack.c.bf16 %v2677_v53, %v2670_v40  ;;  %v8815_v46 = vand.u32 4294901760, %v7517_v29  ;;  %v7627_v10 = vpack.c.bf16 %v2549_v0, %v2546_v27  ;;  %v4345_v0 = vld [vmem:[%s8577_s5] ss:$0 sm:$0xff] }
 0x267   :  { %8810 = vst [vmem:[#allocation50_spill] sm:$0xff] %v7609_v23  ;;  %v7630_v51 = vpack.c.bf16 %v2501_v60, %v2498_v43  ;;  %v5889_v40 = vpack.c.bf16 %v7217_v18, %v7215_v33  ;;  %v5891_v14 = vpack.c.bf16 %v7222_v20, %v7219_v7  ;;  %v5895_v53 = vpack.c.bf16 %v7232_v3, %v7230_v54 }
 0x268   :  { %5880 = vmatpush3.bf16.msra.mxu1 %v5879_v39  ;;  %5848 = vmatpush3.bf16.msra.mxu0 %v7609_v23  ;;  %v7617_v39 = vpack.c.bf16 %v8812_v13, %v8811_v49  ;;  %v7623_v58 = vpack.c.bf16 %v8815_v46, %v8814_v34  ;;  %8816 = vst [vmem:[#allocation52_spill] sm:$0xff] %v7627_v10  ;;  %v8819_v49 = vld [vmem:[#allocation35_spill] sm:$0xff]  ;;  %v8821_v34 = vld [vmem:[#allocation37_spill] sm:$0xff]  ;;  %8838 = vst [vmem:[#allocation54_spill] sm:$0xff] %v7712_v22 }
 0x269   :  { %5882 = vmatprep.subr.bf16.mxu1 %v5881_v42  ;;  %8817 = vst [vmem:[#allocation53_spill] sm:$0xff] %v7630_v51  ;;  %v5899_v13 = vpack.c.bf16 %v8819_v49, %v7268_v35 }
 0x26a   :  { %8813 = vst [vmem:[#allocation51_spill] sm:$0xff] %v7617_v39  ;;  %5850 = vmatprep.subr.bf16.mxu0 %v7617_v39 }
 0x26c   :  { %5884 = vmatpush3.bf16.msra.mxu1 %v5883_v41  ;;  %5852 = vmatpush3.bf16.msra.mxu0 %v7623_v58  ;;  %v5893_v41 = vpack.c.bf16 %v7226_v28, %v7224_v24 }
 0x26d   :  { %5886 = vmatprep.subr.bf16.mxu1 %v5885_v37  ;;  %5854 = vmatprep.subr.bf16.mxu0 %v7627_v10  ;;  %v5897_v37 = vpack.c.bf16 %v7259_v61, %v7255_v17 }
 0x270   :  { %5888 = vmatpush3.bf16.msra.mxu1 %v5887_v52  ;;  %5856 = vmatpush3.bf16.msra.mxu0 %v7630_v51  ;;  %v8820_v52 = vld [vmem:[#allocation36_spill] sm:$0xff] }
 0x271   :  { %5922 = vmatprep.subr.bf16.mxu1 %v7251_v45  ;;  %5890 = vmatprep.subr.bf16.mxu0 %v5889_v40  ;;  %v5901_v46 = vpack.c.bf16 %v8821_v34, %v8820_v52  ;;  %v7673_v40 = vld [vmem:[#allocation10 + $0x50] sm:$0xff] }
 0x272   :  { %8822 = vst [vmem:[#allocation34_spill] sm:$0xff] %v7673_v40 }
 0x2e4   :  { %v1241_v43 = vpop.f32.mrb[0].mxu1 }
 0x2e5   :  { %v6209_v60 = vadd.f32 %v4345_v0, %v1241_v43  ;;  %v5278_v1 = vpop.f32.mrb[1].mxu1  ;;  %v7675_v0 = vld [vmem:[#allocation10 + $0x58] sm:$0xff]  ;;  %v7677_v43 = vld [vmem:[#allocation10 + $0xe0] sm:$0xff] }
 0x2e6   :  { %8823 = vst [vmem:[#allocation35_spill] sm:$0xff] %v7675_v0  ;;  %8824 = vst [vmem:[#allocation36_spill] sm:$0xff] %v7677_v43  ;;  %v8826_v1 = vld [vmem:[#allocation39_spill] sm:$0xff] }
 0x2e7   :  { %vm1245_vm3 = vcmp.gt.f32.partialorder %v6209_v60, 0.0  ;;  %v1246_v2 = vmul.f32 0.2, %v6209_v60 }
 0x2e9   :  { %v1247_v30 = vsel %vm1245_vm3, %v6209_v60, %v1246_v2  ;;  %v8825_v60 = vld [vmem:[#allocation38_spill] sm:$0xff] }
 0x2ea   :  { %v7647_v63 = vand.u32 4294901760, %v1247_v30  ;;  %4278 = vst [vmem:[#allocation12] sm:$0xff] %v1247_v30  ;;  %v5903_v2 = vpack.c.bf16 %v8826_v1, %v8825_v60 }
 0x2ec   :  { %v2552_v42 = vsub.f32 %v1247_v30, %v7647_v63  ;;  %2792 = vmatprep.mubr.f32.mxu1 %v7647_v63  ;;  %v8687_v30 = vand.u32 4294901760, %v7673_v40 }
 0x2ed   :  { %2794 = vmatmul.mubr.f32.vlgmr.msra.gmra.mrb[4].mxu1 %v6777_v26 }
 0x2ee   :  { %5924 = vmatpush3.bf16.msra.mxu1 %v7257_v57  ;;  %v2553_v8 = vand.u32 4294901760, %v2552_v42  ;;  %v7703_v27 = vsub.f32 %v7673_v40, %v8687_v30  ;;  %v8846_v40 = vld [vmem:[#allocation46_spill] sm:$0xff] }
 0x2ef   :  { %5926 = vmatprep.subr.bf16.mxu1 %v7261_v15 }
 0x2f0   :  { %3036 = vmatprep.mubr.f32.mxu1 %v2553_v8  ;;  %v2554_v31 = vsub.f32 %v2552_v42, %v2553_v8  ;;  %v7684_v8 = vld [vmem:[#allocation10 + $0xe8] sm:$0xff] }
 0x2f1   :  { %8827 = vst [vmem:[#allocation37_spill] sm:$0xff] %v7684_v8 }
 0x2f2   :  { %5928 = vmatpush3.bf16.msra.mxu1 %v7276_v21  ;;  %v2555_v50 = vand.u32 4294901760, %v2554_v31  ;;  %v8828_v31 = vld [vmem:[#allocation40_spill] sm:$0xff] }
 0x2f3   :  { %5930 = vmatprep.subr.bf16.mxu1 %v7290_v9 }
 0x2f4   :  { %2556 = vmatprep.mubr.f32.mxu0 %v2555_v50  ;;  %v8829_v50 = vld [vmem:[#allocation41_spill] sm:$0xff] }
 0x2f5   :  { %2562 = vmatmul.mubr.f32.vlgmr.msra.gmra.mrb[4].mxu0 %v8818_v48  ;;  %v7690_v48 = vld [vmem:[#allocation10 + $0x60] sm:$0xff]  ;;  %8835 = vst [vmem:[#allocation41_spill] sm:$0xff] %v7703_v27 }
 0x2f6   :  { %5892 = vmatpush3.bf16.msra.mxu0 %v5891_v14  ;;  %5932 = vmatpush3.bf16.msra.mxu1 %v7298_v12  ;;  %v5905_v14 = vpack.c.bf16 %v8829_v50, %v8828_v31  ;;  %8830 = vst [vmem:[#allocation38_spill] sm:$0xff] %v7690_v48 }
 0x2f7   :  { %2929 = vmatprep.mubr.f32.mxu0 %v2552_v42  ;;  %5894 = vmatprep.subr.bf16.mxu0 %v5893_v41  ;;  %v8690_v42 = vand.u32 4294901760, %v7675_v0  ;;  %v8841_v41 = vld [vmem:[#allocation45_spill] sm:$0xff] }
 0x2f8   :  { %5934 = vmatprep.subr.bf16.mxu1 %v7301_v36 }
 0x2f9   :  { %v7708_v29 = vsub.f32 %v7675_v0, %v8690_v42 }
 0x2fa   :  { %5896 = vmatpush3.bf16.msra.mxu0 %v5895_v53  ;;  %5936 = vmatpush3.bf16.msra.mxu1 %v7305_v56  ;;  %v7692_v53 = vld [vmem:[#allocation10 + $0x68] sm:$0xff] }
 0x2fb   :  { %5898 = vmatprep.subr.bf16.mxu0 %v5897_v37  ;;  %5938 = vmatprep.subr.bf16.mxu1 %v7577_v5  ;;  %8831 = vst [vmem:[#allocation39_spill] sm:$0xff] %v7692_v53  ;;  %8836 = vst [vmem:[#allocation42_spill] sm:$0xff] %v7708_v29  ;;  %v8840_v37 = vld [vmem:[#allocation44_spill] sm:$0xff]  ;;  %v8703_v0 = vand.u32 4294901760, %v7708_v29  ;;  %v8849_v30 = vand.u32 4294901760, %v7692_v53 }
 0x2fc   :  { %v5909_v26 = vpack.c.bf16 %v8841_v41, %v8840_v37  ;;  %v8847_v41 = vld [vmem:[#allocation47_spill] sm:$0xff] }
 0x2fe   :  { %5900 = vmatpush3.bf16.msra.mxu0 %v5899_v13  ;;  %5940 = vmatpush3.bf16.msra.mxu1 %v7589_v55  ;;  %v7695_v13 = vld [vmem:[#allocation10 + $0xf0] sm:$0xff] }
 0x2ff   :  { %5902 = vmatprep.subr.bf16.mxu0 %v5901_v46  ;;  %5942 = vmatprep.subr.bf16.mxu1 %v7603_v44  ;;  %8832 = vst [vmem:[#allocation40_spill] sm:$0xff] %v7695_v13  ;;  %v8834_v46 = vld [vmem:[#allocation43_spill] sm:$0xff]  ;;  %v8844_v44 = vand.u32 4294901760, %v7684_v8 }
 0x300   :  { %v5907_v25 = vpack.c.bf16 %v8834_v46, %v8833_v16  ;;  %8837 = vst [vmem:[#allocation43_spill] sm:$0xff] %v7710_v4 }
 0x302   :  { %5904 = vmatpush3.bf16.msra.mxu0 %v5903_v2  ;;  %5944 = vmatpush3.bf16.msra.mxu1 %v7609_v23  ;;  %v7714_v2 = vld [vmem:[#allocation10 + $0x78] sm:$0xff]  ;;  %v8842_v23 = vand.u32 4294901760, %v7677_v43 }
 0x303   :  { %8839 = vst [vmem:[#allocation55_spill] sm:$0xff] %v7714_v2  ;;  %5906 = vmatprep.subr.bf16.mxu0 %v5905_v14  ;;  %5946 = vmatprep.subr.bf16.mxu1 %v7617_v39  ;;  %v7730_v14 = vsub.f32 %v7684_v8, %v8844_v44  ;;  %v8848_v44 = vand.u32 4294901760, %v7690_v48  ;;  %v8850_v8 = vand.u32 4294901760, %v7695_v13  ;;  %v8857_v29 = vand.u32 4294901760, %v7714_v2 }
 0x304   :  { %v7724_v42 = vsub.f32 %v7677_v43, %v8842_v23  ;;  %v5911_v23 = vpack.c.bf16 %v8847_v41, %v8846_v40 }
 0x305   :  { %8845 = vst [vmem:[#allocation56_spill] sm:$0xff] %v7730_v14  ;;  %v7744_v39 = vsub.f32 %v7690_v48, %v8848_v44  ;;  %v7755_v43 = vsub.f32 %v7695_v13, %v8850_v8  ;;  %v7763_v44 = vld [vmem:[#allocation10 + $0x80] sm:$0xff]  ;;  %v7765_v48 = vld [vmem:[#allocation10 + $0x88] sm:$0xff]  ;;  %v8855_v8 = vand.u32 4294901760, %v7712_v22 }
 0x306   :  { %8843 = vst [vmem:[#allocation44_spill] sm:$0xff] %v7724_v42  ;;  %5908 = vmatpush3.bf16.msra.mxu0 %v5907_v25  ;;  %5948 = vmatpush3.bf16.msra.mxu1 %v7623_v58  ;;  %v7749_v25 = vsub.f32 %v7692_v53, %v8849_v30  ;;  %v8853_v53 = vand.u32 4294901760, %v7710_v4  ;;  %v7790_v30 = vld [vmem:[#allocation10 + $0x8] sm:$0xff] }
 0x307   :  { %5910 = vmatprep.subr.bf16.mxu0 %v5909_v26  ;;  %5950 = vmatprep.subr.bf16.mxu1 %v7627_v10  ;;  %v8851_v26 = vand.u32 4294901760, %v7703_v27  ;;  %v7776_v13 = vsub.f32 %v7712_v22, %v8855_v8  ;;  %v7808_v8 = vld [vmem:[#allocation10 + $0x10] sm:$0xff]  ;;  %v8867_v27 = vpack.c.bf16 %v7539_v38, %v7534_v62 }
 0x308   :  { %v7771_v55 = vsub.f32 %v7710_v4, %v8853_v53  ;;  %v7788_v53 = vld [vmem:[#allocation10] sm:$0xff]  ;;  %v7802_v4 = vld [vmem:[#allocation10 + $0x90] sm:$0xff]  ;;  %v8865_v22 = vand.u32 4294901760, %v7749_v25 }
 0x309   :  { %v7761_v10 = vpack.c.bf16 %v8703_v0, %v8851_v26  ;;  %8856 = vst [vmem:[#allocation57_spill] sm:$0xff] %v7776_v13  ;;  %v7781_v26 = vsub.f32 %v7714_v2, %v8857_v29  ;;  %v8859_v0 = vpack.c.bf16 %v7529_v32, %v7524_v59  ;;  %v8860_v29 = vand.u32 4294901760, %v7724_v42 }
 0x30a   :  { %8854 = vst [vmem:[#allocation47_spill] sm:$0xff] %v7771_v55  ;;  %5912 = vmatpush3.bf16.msra.mxu0 %v5911_v23  ;;  %5952 = vmatpush3.bf16.msra.mxu1 %v7630_v51  ;;  %v8861_v23 = vand.u32 4294901760, %v7730_v14  ;;  %v8863_v51 = vld [vmem:[#allocation33_spill] sm:$0xff]  ;;  %v8869_v14 = vand.u32 4294901760, %v7217_v18 }
 0x30b   :  { %8852 = vst [vmem:[#allocation46_spill] sm:$0xff] %v7761_v10  ;;  %8858 = vst [vmem:[#allocation58_spill] sm:$0xff] %v7781_v26  ;;  %5914 = vmatprep.subr.bf16.mxu0 %v8859_v0  ;;  %5986 = vmatprep.subr.bf16.mxu1 %v7251_v45  ;;  %v7804_v45 = vld [vmem:[#allocation10 + $0x98] sm:$0xff]  ;;  %v8864_v0 = vand.u32 4294901760, %v7744_v39 }
 0x30c   :  { %v7798_v2 = vpack.c.bf16 %v8861_v23, %v8860_v29  ;;  %v7810_v10 = vld [vmem:[#allocation10 + $0x18] sm:$0xff] }
 0x30d   :  { %3040 = vmatmul.mubr.f32.vlgmr.msra.gmra.mrb[6].mxu1 %v8863_v51  ;;  %v8868_v51 = vand.u32 4294901760, %v7215_v33  ;;  %v8872_v33 = vand.u32 4294901760, %v7771_v55 }
 0x30e   :  { %8862 = vst [vmem:[#allocation59_spill] sm:$0xff] %v7798_v2  ;;  %v7819_v2 = vpack.c.bf16 %v8865_v22, %v8864_v0  ;;  %5916 = vmatpush3.bf16.msra.mxu0 %v8867_v27  ;;  %5988 = vmatpush3.bf16.msra.mxu1 %v7257_v57  ;;  %v8870_v22 = vpack.c.bf16 %v7557_v6, %v7555_v47  ;;  %v8871_v57 = vand.u32 4294901760, %v7755_v43  ;;  %v8878_v27 = vand.u32 4294901760, %v7765_v48 }
 0x30f   :  { %v5953_v42 = vpack.c.bf16 %v8869_v14, %v8868_v51  ;;  %3310 = vmatprep.mubr.f32.mxu1 %v7647_v63  ;;  %v8874_v14 = vand.u32 4294901760, %v7776_v13  ;;  %v8875_v51 = vand.u32 4294901760, %v7781_v26  ;;  %5990 = vmatprep.subr.bf16.mxu1 %v7261_v15  ;;  %v8880_v15 = vand.u32 4294901760, %v7219_v7 }
 0x310   :  { %8866 = vst [vmem:[#allocation33_spill] sm:$0xff] %v7819_v2  ;;  %5918 = vmatprep.subr.bf16.mxu0 %v8870_v22  ;;  %v7841_v18 = vpack.c.bf16 %v8872_v33, %v8871_v57  ;;  %v8877_v22 = vand.u32 4294901760, %v7763_v44  ;;  %v7858_v29 = vsub.f32 %v7765_v48, %v8878_v27  ;;  %v8883_v57 = vand.u32 4294901760, %v7790_v30 }
 0x311   :  { %v7847_v23 = vpack.c.bf16 %v8875_v51, %v8874_v14  ;;  %v8879_v14 = vpack.c.bf16 %v7567_v19, %v7565_v11  ;;  %v8881_v51 = vand.u32 4294901760, %v7222_v20  ;;  %v8884_v7 = vand.u32 4294901760, %v7224_v24 }
 0x312   :  { %8873 = vst [vmem:[#allocation60_spill] sm:$0xff] %v7841_v18  ;;  %v7853_v0 = vsub.f32 %v7763_v44, %v8877_v22  ;;  %5992 = vmatpush3.bf16.msra.mxu1 %v7276_v21  ;;  %v7878_v33 = vsub.f32 %v7790_v30, %v8883_v57  ;;  %v7880_v18 = vld [vmem:[#allocation10 + $0xa0] sm:$0xff]  ;;  %v8885_v20 = vand.u32 4294901760, %v7226_v28  ;;  %v8888_v24 = vand.u32 4294901760, %v7808_v8 }
 0x313   :  { %8876 = vst [vmem:[#allocation61_spill] sm:$0xff] %v7847_v23  ;;  %5920 = vmatpush3.bf16.msra.mxu0 %v8879_v14  ;;  %v5955_v22 = vpack.c.bf16 %v8881_v51, %v8880_v15  ;;  %v8882_v23 = vand.u32 4294901760, %v7788_v53  ;;  %5994 = vmatprep.subr.bf16.mxu1 %v7290_v9  ;;  %v8886_v14 = vand.u32 4294901760, %v7802_v4  ;;  %v8887_v15 = vand.u32 4294901760, %v7804_v45  ;;  %v7897_v51 = vld [vmem:[#allocation10 + $0xa8] sm:$0xff] }
 0x314   :  { %5954 = vmatprep.subr.bf16.mxu0 %v5953_v42  ;;  %v5957_v21 = vpack.c.bf16 %v8885_v20, %v8884_v7  ;;  %v7904_v28 = vsub.f32 %v7808_v8, %v8888_v24  ;;  %v8890_v7 = vand.u32 4294901760, %v7810_v10  ;;  %v8894_v2 = vand.u32 4294901760, %v7232_v3 }
 0x315   :  { %v7873_v27 = vsub.f32 %v7788_v53, %v8882_v23  ;;  %v7890_v23 = vsub.f32 %v7802_v4, %v8886_v14  ;;  %v7895_v57 = vsub.f32 %v7804_v45, %v8887_v15  ;;  %v8892_v14 = vld [vmem:[#allocation32_spill] sm:$0xff]  ;;  %v8893_v15 = vand.u32 4294901760, %v7230_v54  ;;  %v7925_v54 = vld [vmem:[#allocation10 + $0x20] sm:$0xff] }
 0x316   :  { %8889 = vst [vmem:[#allocation62_spill] sm:$0xff] %v7904_v28  ;;  %v7909_v20 = vsub.f32 %v7810_v10, %v8890_v7  ;;  %2932 = vmatmul.mubr.f32.vlgmr.msra.gmra.mrb[6].mxu0 %v8892_v14  ;;  %v8723_v42 = vand.u32 4294901760, %v7880_v18  ;;  %v8895_v24 = vand.u32 4294901760, %v7255_v17  ;;  %v8896_v9 = vand.u32 4294901760, %v7259_v61  ;;  %5996 = vmatpush3.bf16.msra.mxu1 %v7298_v12 }
 0x317   :  { %v5959_v26 = vpack.c.bf16 %v8894_v2, %v8893_v15  ;;  %5956 = vmatpush3.bf16.msra.mxu0 %v5955_v22  ;;  %3206 = vmatprep.mubr.f32.mxu0 %v7647_v63  ;;  %v8721_v7 = vand.u32 4294901760, %v7873_v27  ;;  %v8720_v55 = vand.u32 4294901760, %v7878_v33  ;;  %v8722_v14 = vand.u32 4294901760, %v7897_v51 }
 0x318   :  { %8891 = vst [vmem:[#allocation63_spill] sm:$0xff] %v7909_v20  ;;  %v5961_v13 = vpack.c.bf16 %v8896_v9, %v8895_v24  ;;  %5958 = vmatprep.subr.bf16.mxu0 %v5957_v21  ;;  %v8897_v3 = vand.u32 4294901760, %v7268_v35  ;;  %v8898_v63 = vand.u32 4294901760, %v8819_v49  ;;  %v8899_v17 = vand.u32 4294901760, %v8820_v52  ;;  %v7938_v24 = vld [vmem:[#allocation10 + $0x28] sm:$0xff]  ;;  %5998 = vmatprep.subr.bf16.mxu1 %v7301_v36 }
 0x319   :  { %v8900_v61 = vand.u32 4294901760, %v8821_v34  ;;  %v8724_v9 = vand.u32 4294901760, %v7890_v23  ;;  %v8901_v12 = vand.u32 4294901760, %v7853_v0  ;;  %v8902_v49 = vand.u32 4294901760, %v7858_v29 }
 0x31a   :  { %v5963_v2 = vpack.c.bf16 %v8898_v63, %v8897_v3  ;;  %v8725_v52 = vand.u32 4294901760, %v7904_v28  ;;  %v8726_v34 = vand.u32 4294901760, %v7909_v20  ;;  %v8903_v3 = vand.u32 4294901760, %v8825_v60  ;;  %6000 = vmatpush3.bf16.msra.mxu1 %v7305_v56 }
 0x31b   :  { %v5965_v22 = vpack.c.bf16 %v8900_v61, %v8899_v17  ;;  %v3600_v35 = vsub.f32 %v7853_v0, %v8901_v12  ;;  %v3607_v21 = vsub.f32 %v7858_v29, %v8902_v49  ;;  %v8904_v63 = vand.u32 4294901760, %v8826_v1  ;;  %5960 = vmatpush3.bf16.msra.mxu0 %v5959_v26  ;;  %6002 = vmatprep.subr.bf16.mxu1 %v7577_v5 }
 0x31c   :  { %v8905_v61 = vand.u32 4294901760, %v8828_v31  ;;  %v8906_v36 = vand.u32 4294901760, %v8829_v50  ;;  %v7960_v12 = vsub.f32 %v7880_v18, %v8723_v42  ;;  %v8727_v49 = vand.u32 4294901760, %v7925_v54  ;;  %5962 = vmatprep.subr.bf16.mxu0 %v5961_v13 }
 0x31d   :  { %v5967_v17 = vpack.c.bf16 %v8904_v63, %v8903_v3  ;;  %v3488_v60 = vsub.f32 %v7873_v27, %v8721_v7  ;;  %v3495_v1 = vsub.f32 %v7878_v33, %v8720_v55  ;;  %v7972_v31 = vsub.f32 %v7897_v51, %v8722_v14  ;;  %v7975_v3 = vld [vmem:[#allocation10 + $0xb0] sm:$0xff] }
 0x31e   :  { %v5969_v15 = vpack.c.bf16 %v8906_v36, %v8905_v61  ;;  %8907 = vst [vmem:[#allocation32_spill] sm:$0xff] %v7960_v12  ;;  %v8728_v50 = vand.u32 4294901760, %v7938_v24  ;;  %v8909_v26 = vand.u32 4294901760, %v8833_v16  ;;  %v8910_v63 = vand.u32 4294901760, %v8834_v46  ;;  %v8913_v46 = vld [vmem:[#allocation45_spill] sm:$0xff] }
 0x31f   :  { %8908 = vst [vmem:[#allocation64_spill] sm:$0xff] %v7972_v31  ;;  %v3614_v36 = vsub.f32 %v7890_v23, %v8724_v9  ;;  %v8911_v55 = vand.u32 4294901760, %v7895_v57  ;;  %v3601_v14 = vand.u32 4294901760, %v3600_v35  ;;  %v3608_v42 = vand.u32 4294901760, %v3607_v21  ;;  %5964 = vmatpush3.bf16.msra.mxu0 %v5963_v2  ;;  %v8922_v9 = vld [vmem:[#allocation49_spill] sm:$0xff] }
 0x320   :  { %v5971_v61 = vpack.c.bf16 %v8910_v63, %v8909_v26  ;;  %v3502_v56 = vsub.f32 %v7904_v28, %v8725_v52  ;;  %v3509_v16 = vsub.f32 %v7909_v20, %v8726_v34  ;;  %v8912_v13 = vand.u32 4294901760, %v8840_v37  ;;  %5966 = vmatprep.subr.bf16.mxu0 %v5965_v22  ;;  %v8033_v28 = vld [vmem:[#allocation10 + $0x38] sm:$0xff] }
 0x321   :  { %v3621_v7 = vsub.f32 %v7895_v57, %v8911_v55  ;;  %v8914_v26 = vand.u32 4294901760, %v8913_v46  ;;  %v8003_v5 = vsub.f32 %v7925_v54, %v8727_v49  ;;  %v8005_v55 = vld [vmem:[#allocation10 + $0xb8] sm:$0xff]  ;;  %v3489_v21 = vand.u32 4294901760, %v3488_v60 }
 0x322   :  { %v3496_v52 = vand.u32 4294901760, %v3495_v1  ;;  %v8012_v37 = vsub.f32 %v7938_v24, %v8728_v50  ;;  %v8917_v46 = vld [vmem:[#allocation48_spill] sm:$0xff]  ;;  %v8919_v49 = vand.u32 4294901760, %v8847_v41  ;;  %v8920_v2 = vand.u32 4294901760, %v7524_v59 }
 0x323   :  { %v5973_v63 = vpack.c.bf16 %v8914_v26, %v8912_v13  ;;  %8915 = vst [vmem:[#allocation45_spill] sm:$0xff] %v8003_v5  ;;  %v8014_v13 = vld [vmem:[#allocation10 + $0x30] sm:$0xff]  ;;  %6004 = vmatpush3.bf16.msra.mxu1 %v8917_v46  ;;  %v8918_v26 = vand.u32 4294901760, %v8846_v40  ;;  %v8921_v60 = vand.u32 4294901760, %v7529_v32  ;;  %v3615_v34 = vand.u32 4294901760, %v3614_v36  ;;  %5968 = vmatpush3.bf16.msra.mxu0 %v5967_v17 }
 0x324   :  { %8916 = vst [vmem:[#allocation65_spill] sm:$0xff] %v8012_v37  ;;  %v3622_v50 = vand.u32 4294901760, %v3621_v7  ;;  %6006 = vmatprep.subr.bf16.mxu1 %v8922_v9  ;;  %v8030_v20 = vpack.c.bf16 %v3608_v42, %v3601_v14  ;;  %v3503_v46 = vand.u32 4294901760, %v3502_v56  ;;  %v3510_v22 = vand.u32 4294901760, %v3509_v16  ;;  %v8047_v14 = vld [vmem:[#allocation10 + $0xc0] sm:$0xff]  ;;  %v8049_v9 = vld [vmem:[#allocation10 + $0xc8] sm:$0xff]  ;;  %5970 = vmatprep.subr.bf16.mxu0 %v5969_v15 }
 0x325   :  { %v8021_v35 = vpack.c.bf16 %v8919_v49, %v8918_v26  ;;  %v8027_v1 = vpack.c.bf16 %v8921_v60, %v8920_v2  ;;  %v8733_v40 = vand.u32 4294901760, %v8005_v55  ;;  %v8923_v41 = vand.u32 4294901760, %v7960_v12  ;;  %v8934_v15 = vld [vmem:[#allocation51_spill] sm:$0xff] }
 0x326   :  { %v8734_v32 = vand.u32 4294901760, %v8003_v5  ;;  %v8924_v49 = vand.u32 4294901760, %v7975_v3  ;;  %v8926_v36 = vand.u32 4294901760, %v7534_v62  ;;  %v8927_v56 = vand.u32 4294901760, %v7539_v38 }
 0x327   :  { %v8038_v59 = vsub.f32 %v7960_v12, %v8923_v41  ;;  %v8057_v26 = vpack.c.bf16 %v3496_v52, %v3489_v21  ;;  %v8928_v2 = vand.u32 4294901760, %v7972_v31  ;;  %v8735_v41 = vand.u32 4294901760, %v8012_v37  ;;  %5972 = vmatpush3.bf16.msra.mxu0 %v5971_v61 }
 0x328   :  { %v8044_v7 = vsub.f32 %v7975_v3, %v8924_v49  ;;  %v8055_v16 = vpack.c.bf16 %v8927_v56, %v8926_v36  ;;  %v8929_v49 = vld [vmem:[#allocation50_spill] sm:$0xff]  ;;  %v8930_v17 = vand.u32 4294901760, %v7555_v47  ;;  %v8931_v62 = vand.u32 4294901760, %v7557_v6  ;;  %v4346_v47 = vld [vmem:[%s8579_s7] ss:$0 sm:$0xff]  ;;  %5974 = vmatprep.subr.bf16.mxu0 %v5973_v63 }
 0x329   :  { %v8062_v60 = vsub.f32 %v7972_v31, %v8928_v2  ;;  %6008 = vmatpush3.bf16.msra.mxu1 %v8929_v49  ;;  %v8072_v38 = vpack.c.bf16 %v3622_v50, %v3615_v34  ;;  %v8932_v52 = vand.u32 4294901760, %v7565_v11  ;;  %v8933_v21 = vand.u32 4294901760, %v7567_v19  ;;  %v8081_v2 = vld [vmem:[#allocation10 + $0x40] sm:$0xff]  ;;  %v8083_v49 = vld [vmem:[#allocation10 + $0x48] sm:$0xff]  ;;  %v8098_v50 = vld [vmem:[#allocation10 + $0xd0] sm:$0xff] }
 0x32a   :  { %8925 = vst [vmem:[#allocation48_spill] sm:$0xff] %v8044_v7  ;;  %v8070_v42 = vpack.c.bf16 %v8931_v62, %v8930_v17  ;;  %v8738_v56 = vand.u32 4294901760, %v8033_v28  ;;  %6010 = vmatprep.subr.bf16.mxu1 %v8934_v15  ;;  %v8089_v6 = vpack.c.bf16 %v3510_v22, %v3503_v46  ;;  %v8094_v11 = vsub.f32 %v8005_v55, %v8733_v40  ;;  %v8100_v17 = vld [vmem:[#allocation10 + $0xd8] sm:$0xff]  ;;  %v5518_v15 = vpop.f32.mrb[2].mxu1  ;;  %v8943_v31 = vld [vmem:[#allocation53_spill] sm:$0xff] }
 0x32b   :  { %v8078_v36 = vpack.c.bf16 %v8933_v21, %v8932_v52  ;;  %v3629_v62 = vand.u32 4294901760, %v8038_v59  ;;  %v8106_v46 = vsub.f32 %v8003_v5, %v8734_v32  ;;  %v8936_v52 = vand.u32 4294901760, %v8014_v13  ;;  %v2400_v19 = vpop.f32.mrb[3].mxu1  ;;  %5976 = vmatpush3.bf16.msra.mxu0 %v8021_v35 }
 0x32c   :  { %8935 = vst [vmem:[#allocation49_spill] sm:$0xff] %v8094_v11  ;;  %v3636_v40 = vand.u32 4294901760, %v8062_v60  ;;  %v8118_v59 = vsub.f32 %v8012_v37, %v8735_v41  ;;  %v6210_v22 = vadd.f32 %v5518_v15, %v4346_v47  ;;  %v8126_v61 = vsub.f32 %v8033_v28, %v8738_v56  ;;  %v8937_v37 = vld [vmem:[#allocation52_spill] sm:$0xff]  ;;  %5978 = vmatprep.subr.bf16.mxu0 %v8027_v1 }
 0x32d   :  { %v8112_v21 = vsub.f32 %v8014_v13, %v8936_v52  ;;  %6012 = vmatpush3.bf16.msra.mxu1 %v7623_v58  ;;  %v6211_v41 = vadd.f32 %v4346_v47, %v2400_v19  ;;  %v8938_v32 = vand.u32 4294901760, %v8047_v14  ;;  %v8939_v63 = vand.u32 4294901760, %v8049_v9 }
 0x32e   :  { %6014 = vmatprep.subr.bf16.mxu1 %v8937_v37  ;;  %vm2411_vm4 = vcmp.gt.f32.partialorder %v6210_v22, 0.0  ;;  %v2413_v56 = vmul.f32 0.2, %v6210_v22  ;;  %v8940_v60 = vand.u32 4294901760, %v8044_v7  ;;  %v8944_v35 = vand.u32 4294901760, %v8098_v50 }
 0x32f   :  { %v8135_v58 = vsub.f32 %v8047_v14, %v8938_v32  ;;  %v8140_v15 = vsub.f32 %v8049_v9, %v8939_v63  ;;  %vm2410_vm5 = vcmp.gt.f32.partialorder %v6211_v41, 0.0  ;;  %v2412_v19 = vmul.f32 0.2, %v6211_v41  ;;  %5980 = vmatpush3.bf16.msra.mxu0 %v8055_v16 }
 0x330   :  { %v3642_v47 = vsub.f32 %v8044_v7, %v8940_v60  ;;  %v8941_v32 = vand.u32 4294901760, %v8081_v2  ;;  %v8942_v63 = vand.u32 4294901760, %v8083_v49  ;;  %v8157_v5 = vsel %vm2411_vm4, %v6210_v22, %v2413_v56  ;;  %5982 = vmatprep.subr.bf16.mxu0 %v8070_v42 }
 0x331   :  { %6016 = vmatpush3.bf16.msra.mxu1 %v8943_v31  ;;  %v8165_v37 = vsub.f32 %v8098_v50, %v8944_v35  ;;  %4282 = vst [vmem:[#allocation15 + $0x8] sm:$0xff] %v8157_v5  ;;  %v2414_v56 = vsel %vm2410_vm5, %v6211_v41, %v2412_v19  ;;  %v8946_v31 = vand.u32 4294901760, %v8094_v11  ;;  %v8948_v60 = vand.u32 4294901760, %v7763_v44  ;;  %v8950_v19 = vld [vmem:[#allocation31_spill] sm:$0xff] }
 0x332   :  { %v8150_v34 = vsub.f32 %v8081_v2, %v8941_v32  ;;  %v8155_v52 = vsub.f32 %v8083_v49, %v8942_v63  ;;  %v8945_v32 = vand.u32 4294901760, %v8100_v17  ;;  %6050 = vmatprep.subr.bf16.mxu1 %v8030_v20  ;;  %v8179_v35 = vand.u32 4294901760, %v2414_v56  ;;  %4281 = vst [vmem:[#allocation15] sm:$0xff] %v2414_v56 }
 0x333   :  { %v3649_v1 = vsub.f32 %v8094_v11, %v8946_v31  ;;  %v6057_v41 = vpack.c.bf16 %v3636_v40, %v3629_v62  ;;  %v3517_v20 = vand.u32 4294901760, %v8106_v46  ;;  %v3524_v31 = vand.u32 4294901760, %v8118_v59  ;;  %5984 = vmatpush3.bf16.msra.mxu0 %v8078_v36 }
 0x334   :  { %v8170_v7 = vsub.f32 %v8100_v17, %v8945_v32  ;;  %8947 = vst [vmem:[#allocation50_spill] sm:$0xff] %v8179_v35  ;;  %v8949_v32 = vand.u32 4294901760, %v7765_v48  ;;  %3312 = vmatmul.mubr.f32.vlgmr.msra.gmra.mrb[8].mxu1 %v8950_v19  ;;  %v8951_v63 = vand.u32 4294901760, %v8112_v21  ;;  %v8749_v11 = vand.u32 4294901760, %v8150_v34 }
 0x335   :  { %v8197_v48 = vsub.f32 %v2414_v56, %v8179_v35  ;;  %6052 = vmatpush3.bf16.msra.mxu1 %v8057_v26  ;;  %3709 = vmatprep.mubr.f32.mxu1 %v8179_v35  ;;  %v8952_v40 = vand.u32 4294901760, %v8126_v61  ;;  %v3643_v59 = vand.u32 4294901760, %v3642_v47  ;;  %v8953_v56 = vand.u32 4294901760, %v8135_v58 }
 0x336   :  { %v8185_v12 = vpack.c.bf16 %v8949_v32, %v8948_v60  ;;  %v3530_v22 = vsub.f32 %v8112_v21, %v8951_v63  ;;  %v8753_v46 = vand.u32 4294901760, %v8170_v7  ;;  %6054 = vmatprep.subr.bf16.mxu1 %v8072_v38  ;;  %v3650_v60 = vand.u32 4294901760, %v3649_v1  ;;  %3208 = vmatmul.mubr.f32.vlgmr.msra.gmra.mrb[8].mxu0 %v8950_v19 }
 0x337   :  { %v3537_v16 = vsub.f32 %v8126_v61, %v8952_v40  ;;  %v3656_v26 = vsub.f32 %v8135_v58, %v8953_v56  ;;  %v8954_v63 = vand.u32 4294901760, %v8140_v15  ;;  %v8955_v40 = vand.u32 4294901760, %v7788_v53 }
 0x338   :  { %v8956_v62 = vand.u32 4294901760, %v7790_v30  ;;  %v8750_v42 = vand.u32 4294901760, %v8197_v48  ;;  %v6059_v38 = vpack.c.bf16 %v3524_v31, %v3517_v20  ;;  %v3531_v47 = vand.u32 4294901760, %v3530_v22  ;;  %6018 = vmatprep.subr.bf16.mxu0 %v8185_v12 }
 0x339   :  { %v3663_v32 = vsub.f32 %v8140_v15, %v8954_v63  ;;  %v3544_v1 = vsub.f32 %v8150_v34, %v8749_v11  ;;  %v8957_v56 = vand.u32 4294901760, %v8155_v52  ;;  %6056 = vmatpush3.bf16.msra.mxu1 %v8089_v6  ;;  %v3538_v53 = vand.u32 4294901760, %v3537_v16 }
 0x33a   :  { %v8218_v44 = vpack.c.bf16 %v8956_v62, %v8955_v40  ;;  %v3456_v30 = vsub.f32 %v8197_v48, %v8750_v42  ;;  %v8958_v36 = vand.u32 4294901760, %v8165_v37  ;;  %v3677_v20 = vsub.f32 %v8170_v7, %v8753_v46  ;;  %6058 = vmatprep.subr.bf16.mxu1 %v6057_v41  ;;  %v8963_v46 = vld [vmem:[#allocation41_spill] sm:$0xff] }
 0x33b   :  { %v3551_v63 = vsub.f32 %v8155_v52, %v8957_v56  ;;  %v8959_v31 = vand.u32 4294901760, %v7802_v4  ;;  %v8960_v6 = vand.u32 4294901760, %v7804_v45  ;;  %v6061_v40 = vpack.c.bf16 %v3650_v60, %v3643_v59  ;;  %v8965_v59 = vld [vmem:[#allocation42_spill] sm:$0xff] }
 0x33c   :  { %v3670_v22 = vsub.f32 %v8165_v37, %v8958_v36  ;;  %v3657_v56 = vand.u32 4294901760, %v3656_v26  ;;  %v3664_v11 = vand.u32 4294901760, %v3663_v32  ;;  %v3457_v16 = vand.u32 4294901760, %v3456_v30  ;;  %6020 = vmatpush3.bf16.msra.mxu0 %v8218_v44  ;;  %v8969_v30 = vld [vmem:[#allocation44_spill] sm:$0xff] }
 0x33d   :  { %v8243_v62 = vpack.c.bf16 %v8960_v6, %v8959_v31  ;;  %v8961_v42 = vand.u32 4294901760, %v7808_v8  ;;  %v8962_v36 = vand.u32 4294901760, %v7810_v10  ;;  %v3545_v41 = vand.u32 4294901760, %v3544_v1  ;;  %6060 = vmatpush3.bf16.msra.mxu1 %v6059_v38 }
 0x33e   :  { %v3552_v4 = vand.u32 4294901760, %v3551_v63  ;;  %v8964_v45 = vand.u32 4294901760, %v8963_v46  ;;  %v8966_v60 = vand.u32 4294901760, %v8965_v59  ;;  %3458 = vmatprep.mubr.f32.mxu0 %v3457_v16  ;;  %v6063_v19 = vpack.c.bf16 %v3538_v53, %v3531_v47  ;;  %6062 = vmatprep.subr.bf16.mxu1 %v6061_v40 }
 0x33f   :  { %v8250_v35 = vpack.c.bf16 %v8962_v36, %v8961_v42  ;;  %v8967_v8 = vand.u32 4294901760, %v7880_v18  ;;  %v8968_v10 = vand.u32 4294901760, %v7897_v51  ;;  %v3671_v42 = vand.u32 4294901760, %v3670_v22  ;;  %6022 = vmatprep.subr.bf16.mxu0 %v8243_v62 }
 0x340   :  { %v3558_v31 = vsub.f32 %v8963_v46, %v8964_v45  ;;  %v3565_v26 = vsub.f32 %v8965_v59, %v8966_v60  ;;  %v3678_v1 = vand.u32 4294901760, %v3677_v20  ;;  %v6065_v63 = vpack.c.bf16 %v3664_v11, %v3657_v56  ;;  %v8971_v45 = vld [vmem:[#allocation56_spill] sm:$0xff] }
 0x341   :  { %v8263_v32 = vpack.c.bf16 %v8968_v10, %v8967_v8  ;;  %v8970_v6 = vand.u32 4294901760, %v8969_v30  ;;  %v8972_v38 = vand.u32 4294901760, %v8971_v45  ;;  %v8973_v18 = vand.u32 4294901760, %v7925_v54  ;;  %6024 = vmatpush3.bf16.msra.mxu0 %v8250_v35  ;;  %6064 = vmatpush3.bf16.msra.mxu1 %v6063_v19 }
 0x342   :  { %v8974_v51 = vand.u32 4294901760, %v7938_v24  ;;  %v6067_v22 = vpack.c.bf16 %v3552_v4, %v3545_v41  ;;  %v8975_v20 = vand.u32 4294901760, %v7975_v3  ;;  %v8976_v11 = vand.u32 4294901760, %v8005_v55  ;;  %6066 = vmatprep.subr.bf16.mxu1 %v6065_v63 }
 0x343   :  { %v3684_v36 = vsub.f32 %v8969_v30, %v8970_v6  ;;  %v3691_v47 = vsub.f32 %v8971_v45, %v8972_v38  ;;  %v3559_v56 = vand.u32 4294901760, %v3558_v31  ;;  %v3566_v16 = vand.u32 4294901760, %v3565_v26  ;;  %6026 = vmatprep.subr.bf16.mxu0 %v8263_v32  ;;  %v8980_v26 = vld [vmem:[#allocation47_spill] sm:$0xff] }
 0x344   :  { %v8276_v53 = vpack.c.bf16 %v8974_v51, %v8973_v18  ;;  %v8283_v40 = vpack.c.bf16 %v8976_v11, %v8975_v20  ;;  %v6069_v60 = vpack.c.bf16 %v3678_v1, %v3671_v42  ;;  %v8977_v54 = vand.u32 4294901760, %v7744_v39  ;;  %v8986_v20 = vld [vmem:[#allocation57_spill] sm:$0xff] }
 0x345   :  { %v8978_v8 = vand.u32 4294901760, %v7749_v25  ;;  %v3685_v3 = vand.u32 4294901760, %v3684_v36  ;;  %v3692_v4 = vand.u32 4294901760, %v3691_v47  ;;  %v8979_v55 = vand.u32 4294901760, %v7755_v43  ;;  %6068 = vmatpush3.bf16.msra.mxu1 %v6067_v22 }
 0x346   :  { %v3572_v24 = vsub.f32 %v7744_v39, %v8977_v54  ;;  %v8981_v19 = vand.u32 4294901760, %v8980_v26  ;;  %6028 = vmatpush3.bf16.msra.mxu0 %v8276_v53  ;;  %v8982_v42 = vand.u32 4294901760, %v8014_v13  ;;  %v8983_v1 = vand.u32 4294901760, %v8033_v28  ;;  %v8988_v54 = vld [vmem:[#allocation58_spill] sm:$0xff]  ;;  %6070 = vmatprep.subr.bf16.mxu1 %v6069_v60 }
 0x347   :  { %v3579_v41 = vsub.f32 %v7749_v25, %v8978_v8  ;;  %v3698_v31 = vsub.f32 %v7755_v43, %v8979_v55  ;;  %v6071_v38 = vpack.c.bf16 %v3566_v16, %v3559_v56  ;;  %v8984_v63 = vand.u32 4294901760, %v8047_v14  ;;  %6030 = vmatprep.subr.bf16.mxu0 %v8283_v40 }
 0x348   :  { %v3705_v10 = vsub.f32 %v8980_v26, %v8981_v19  ;;  %v8303_v6 = vpack.c.bf16 %v8983_v1, %v8982_v42  ;;  %v8985_v36 = vand.u32 4294901760, %v8049_v9  ;;  %v3573_v18 = vand.u32 4294901760, %v3572_v24  ;;  %v8996_v42 = vld [vmem:[#allocation35_spill] sm:$0xff] }
 0x349   :  { %v3580_v51 = vand.u32 4294901760, %v3579_v41  ;;  %v8987_v11 = vand.u32 4294901760, %v8986_v20  ;;  %v8989_v28 = vand.u32 4294901760, %v8988_v54  ;;  %v6073_v56 = vpack.c.bf16 %v3692_v4, %v3685_v3  ;;  %6072 = vmatpush3.bf16.msra.mxu1 %v6071_v38 }
 0x34a   :  { %v8309_v47 = vpack.c.bf16 %v8985_v36, %v8984_v63  ;;  %v3699_v14 = vand.u32 4294901760, %v3698_v31  ;;  %v3706_v16 = vand.u32 4294901760, %v3705_v10  ;;  %6032 = vmatpush3.bf16.msra.mxu0 %v8303_v6  ;;  %v8990_v9 = vand.u32 4294901760, %v8081_v2  ;;  %v9000_v36 = vld [vmem:[#allocation37_spill] sm:$0xff] }
 0x34b   :  { %v3586_v13 = vsub.f32 %v8986_v20, %v8987_v11  ;;  %v3593_v8 = vsub.f32 %v8988_v54, %v8989_v28  ;;  %v8991_v22 = vand.u32 4294901760, %v8083_v49  ;;  %v6075_v41 = vpack.c.bf16 %v3580_v51, %v3573_v18  ;;  %6074 = vmatprep.subr.bf16.mxu1 %v6073_v56  ;;  %v8994_v49 = vld [vmem:[#allocation34_spill] sm:$0xff] }
 0x34c   :  { %6034 = vmatprep.subr.bf16.mxu0 %v8309_v47  ;;  %v8992_v55 = vand.u32 4294901760, %v8098_v50  ;;  %v8993_v19 = vand.u32 4294901760, %v8100_v17  ;;  %v8333_v31 = vand.u32 4294901760, %v8157_v5  ;;  %v6077_v2 = vpack.c.bf16 %v3706_v16, %v3699_v14  ;;  %v8998_v17 = vld [vmem:[#allocation36_spill] sm:$0xff] }
 0x34d   :  { %v8323_v24 = vpack.c.bf16 %v8991_v22, %v8990_v9  ;;  %v3587_v3 = vand.u32 4294901760, %v3586_v13  ;;  %v3594_v4 = vand.u32 4294901760, %v3593_v8  ;;  %v8995_v10 = vand.u32 4294901760, %v8994_v49  ;;  %6076 = vmatpush3.bf16.msra.mxu1 %v6075_v41  ;;  %v9002_v13 = vld [vmem:[#allocation38_spill] sm:$0xff]  ;;  %v9004_v8 = vld [vmem:[#allocation39_spill] sm:$0xff]  ;;  %v9006_v16 = vld [vmem:[#allocation40_spill] sm:$0xff] }
 0x34e   :  { %v8330_v60 = vpack.c.bf16 %v8993_v19, %v8992_v55  ;;  %v8997_v1 = vand.u32 4294901760, %v8996_v42  ;;  %v8999_v63 = vand.u32 4294901760, %v8998_v17  ;;  %v9001_v18 = vand.u32 4294901760, %v9000_v36  ;;  %6078 = vmatprep.subr.bf16.mxu1 %v6077_v2  ;;  %v9008_v22 = vld [vmem:[#allocation43_spill] sm:$0xff] }
 0x34f   :  { %6036 = vmatpush3.bf16.msra.mxu0 %v8323_v24  ;;  %v6079_v50 = vpack.c.bf16 %v3594_v4, %v3587_v3  ;;  %v8351_v11 = vsub.f32 %v8157_v5, %v8333_v31  ;;  %v9003_v28 = vand.u32 4294901760, %v9002_v13  ;;  %v9005_v56 = vand.u32 4294901760, %v9004_v8  ;;  %v9010_v19 = vld [vmem:[#allocation23_spill] sm:$0xff]  ;;  %v9011_v3 = vld [vmem:[#allocation54_spill] sm:$0xff]  ;;  %v9017_v13 = vld [vmem:[#allocation29_spill] sm:$0xff] }
 0x350   :  { %v8340_v38 = vpack.c.bf16 %v8997_v1, %v8995_v10  ;;  %6038 = vmatprep.subr.bf16.mxu0 %v8330_v60  ;;  %v8347_v51 = vpack.c.bf16 %v9001_v18, %v8999_v63  ;;  %v9007_v9 = vand.u32 4294901760, %v9006_v16  ;;  %v9009_v41 = vand.u32 4294901760, %v9008_v22  ;;  %v9013_v2 = vld [vmem:[#allocation55_spill] sm:$0xff]  ;;  %v9020_v16 = vld [vmem:[#allocation32_spill] sm:$0xff] }
 0x351   :  { %v8358_v14 = vpack.c.bf16 %v9005_v56, %v9003_v28  ;;  %6080 = vmatpush3.bf16.msra.mxu1 %v6079_v50  ;;  %v3470_v55 = vand.u32 4294901760, %v8351_v11  ;;  %v9012_v4 = vand.u32 4294901760, %v9011_v3  ;;  %v9014_v49 = vand.u32 4294901760, %v9013_v2  ;;  %v9015_v50 = vld [vmem:[#allocation24_spill] sm:$0xff]  ;;  %v9018_v28 = vld [vmem:[#allocation62_spill] sm:$0xff]  ;;  %v9019_v8 = vld [vmem:[#allocation63_spill] sm:$0xff] }
 0x352   :  { %6114 = vmatprep.subr.bf16.mxu1 %v8185_v12  ;;  %v8366_v5 = vpack.c.bf16 %v9009_v41, %v9007_v9  ;;  %v6081_v42 = vpack.c.bf16 %v7858_v29, %v7853_v0  ;;  %v6083_v17 = vpack.c.bf16 %v7878_v33, %v7873_v27  ;;  %v9016_v63 = vand.u32 4294901760, %v8197_v48  ;;  %v9021_v9 = vld [vmem:[#allocation64_spill] sm:$0xff]  ;;  %v9022_v41 = vld [vmem:[#allocation30_spill] sm:$0xff]  ;;  %v9023_v3 = vld [vmem:[#allocation45_spill] sm:$0xff] }
 0x353   :  { %6040 = vmatpush3.bf16.msra.mxu0 %v8340_v38  ;;  %v8375_v10 = vpack.c.bf16 %v9014_v49, %v9012_v4  ;;  %v3471_v1 = vsub.f32 %v8351_v11, %v3470_v55  ;;  %v6085_v36 = vpack.c.bf16 %v7895_v57, %v7890_v23  ;;  %v6087_v56 = vpack.c.bf16 %v9019_v8, %v9018_v28  ;;  %v9024_v4 = vld [vmem:[#allocation65_spill] sm:$0xff]  ;;  %v9025_v49 = vld [vmem:[#allocation48_spill] sm:$0xff] }
 0x354   :  { %6042 = vmatprep.subr.bf16.mxu0 %v8347_v51  ;;  %3711 = vmatmul.mubr.f32.vlgmr.msra.gmra.mrb[10].mxu1 %v9010_v19  ;;  %v6089_v22 = vpack.c.bf16 %v9021_v9, %v9020_v16  ;;  %v6091_v2 = vpack.c.bf16 %v9024_v4, %v9023_v3 }
 0x355   :  { %3716 = vmatprep.mubr.f32.mxu1 %v8333_v31  ;;  %6116 = vmatpush3.bf16.msra.mxu1 %v8218_v44  ;;  %v3472_v18 = vand.u32 4294901760, %v3471_v1 }
 0x356   :  { %6118 = vmatprep.subr.bf16.mxu1 %v8243_v62 }
 0x357   :  { %6044 = vmatpush3.bf16.msra.mxu0 %v8358_v14 }
 0x358   :  { %6046 = vmatprep.subr.bf16.mxu0 %v8366_v5  ;;  %3718 = vmatmul.mubr.f32.gmra.mrb[12].mxu1 %v9015_v50 }
 0x359   :  { %6120 = vmatpush3.bf16.msra.mxu1 %v8250_v35  ;;  %3969 = vmatprep.mubr.f32.mxu1 %v9016_v63  ;;  %v6099_v63 = vpack.c.bf16 %v8155_v52, %v8150_v34 }
 0x35a   :  { %6122 = vmatprep.subr.bf16.mxu1 %v8263_v32 }
 0x35b   :  { %6048 = vmatpush3.bf16.msra.mxu0 %v8375_v10 }
 0x35c   :  { %6082 = vmatprep.subr.bf16.mxu0 %v6081_v42  ;;  %v9026_v42 = vld [vmem:[#allocation49_spill] sm:$0xff] }
 0x35d   :  { %6124 = vmatpush3.bf16.msra.mxu1 %v8276_v53  ;;  %v6093_v1 = vpack.c.bf16 %v9026_v42, %v9025_v49 }
 0x35e   :  { %3464 = vmatmul.mubr.f32.vlgmr.msra.gmra.mrb[10].mxu0 %v9017_v13  ;;  %6126 = vmatprep.subr.bf16.mxu1 %v8283_v40  ;;  %v6105_v13 = vpack.c.bf16 %v8971_v45, %v8969_v30  ;;  %v6111_v30 = vpack.c.bf16 %v8988_v54, %v8986_v20  ;;  %v9030_v45 = vld [vmem:[#allocation28_spill] sm:$0xff]  ;;  %v9033_v20 = vld [vmem:[#allocation50_spill] sm:$0xff] }
 0x35f   :  { %3473 = vmatprep.mubr.f32.mxu0 %v3472_v18  ;;  %6084 = vmatpush3.bf16.msra.mxu0 %v6083_v17  ;;  %v6095_v17 = vpack.c.bf16 %v8126_v61, %v8112_v21  ;;  %v6103_v18 = vpack.c.bf16 %v8965_v59, %v8963_v46  ;;  %v6109_v46 = vpack.c.bf16 %v8980_v26, %v7755_v43  ;;  %v9027_v59 = vld [vmem:[#allocation27_spill] sm:$0xff]  ;;  %v9031_v43 = vand.u32 4294901760, %v7873_v27 }
 0x360   :  { %6086 = vmatprep.subr.bf16.mxu0 %v6085_v36  ;;  %v6101_v36 = vpack.c.bf16 %v8170_v7, %v8165_v37  ;;  %v9032_v26 = vand.u32 4294901760, %v7878_v33  ;;  %v9037_v33 = vand.u32 4294901760, %v9018_v28  ;;  %v9038_v27 = vand.u32 4294901760, %v9019_v8 }
 0x361   :  { %6128 = vmatpush3.bf16.msra.mxu1 %v8303_v6  ;;  %v9045_v8 = vand.u32 4294901760, %v9026_v42 }
 0x362   :  { %3479 = vmatmul.mubr.f32.gmra.mrb[12].mxu0 %v9022_v41  ;;  %6130 = vmatprep.subr.bf16.mxu1 %v8309_v47 }
 0x363   :  { %6088 = vmatpush3.bf16.msra.mxu0 %v6087_v56  ;;  %3853 = vmatprep.mubr.f32.mxu0 %v8197_v48  ;;  %v6097_v48 = vpack.c.bf16 %v8140_v15, %v8135_v58  ;;  %v6107_v56 = vpack.c.bf16 %v7749_v25, %v7744_v39  ;;  %v9028_v39 = vand.u32 4294901760, %v7853_v0  ;;  %v9029_v25 = vand.u32 4294901760, %v7858_v29  ;;  %v9036_v29 = vld [vmem:[#allocation25_spill] sm:$0xff] }
 0x364   :  { %6090 = vmatprep.subr.bf16.mxu0 %v6089_v22  ;;  %v6147_v22 = vpack.c.bf16 %v9032_v26, %v9031_v43 }
 0x365   :  { %6132 = vmatpush3.bf16.msra.mxu1 %v8323_v24 }
 0x366   :  { %6134 = vmatprep.subr.bf16.mxu1 %v8330_v60 }
 0x367   :  { %6092 = vmatpush3.bf16.msra.mxu0 %v6091_v2  ;;  %v9050_v2 = vand.u32 4294901760, %v8150_v34  ;;  %v9054_v34 = vld [vmem:[#allocation46_spill] sm:$0xff] }
 0x368   :  { %6094 = vmatprep.subr.bf16.mxu0 %v6093_v1 }
 0x369   :  { %6136 = vmatpush3.bf16.msra.mxu1 %v8340_v38 }
 0x36a   :  { %6138 = vmatprep.subr.bf16.mxu1 %v8347_v51 }
 0x36b   :  { %6096 = vmatpush3.bf16.msra.mxu0 %v6095_v17 }
 0x36c   :  { %6098 = vmatprep.subr.bf16.mxu0 %v6097_v48 }
 0x36d   :  { %6140 = vmatpush3.bf16.msra.mxu1 %v8358_v14 }
 0x36e   :  { %6142 = vmatprep.subr.bf16.mxu1 %v8366_v5 }
 0x36f   :  { %6100 = vmatpush3.bf16.msra.mxu0 %v6099_v63 }
 0x370   :  { %6102 = vmatprep.subr.bf16.mxu0 %v6101_v36 }
 0x371   :  { %6144 = vmatpush3.bf16.msra.mxu1 %v8375_v10 }
 0x372   :  { %6178 = vmatprep.subr.bf16.mxu1 %v8185_v12  ;;  %v6145_v12 = vpack.c.bf16 %v9029_v25, %v9028_v39 }
 0x373   :  { %6104 = vmatpush3.bf16.msra.mxu0 %v6103_v18 }
 0x374   :  { %6106 = vmatprep.subr.bf16.mxu0 %v6105_v13  ;;  %3973 = vmatmul.mubr.f32.vlgmr.msra.gmra.mrb[14].mxu1 %v9027_v59 }
 0x375   :  { %3980 = vmatprep.mubr.f32.mxu1 %v3470_v55  ;;  %6180 = vmatpush3.bf16.msra.mxu1 %v8218_v44  ;;  %v9034_v44 = vand.u32 4294901760, %v7890_v23  ;;  %v9039_v23 = vand.u32 4294901760, %v9020_v16  ;;  %v9043_v55 = vand.u32 4294901760, %v9024_v4 }
 0x376   :  { %6182 = vmatprep.subr.bf16.mxu1 %v8243_v62  ;;  %v9035_v62 = vand.u32 4294901760, %v7895_v57  ;;  %v9040_v57 = vand.u32 4294901760, %v9021_v9  ;;  %v9047_v9 = vand.u32 4294901760, %v8126_v61  ;;  %v9053_v61 = vand.u32 4294901760, %v8170_v7  ;;  %v9057_v7 = vld [vmem:[#allocation60_spill] sm:$0xff] }
 0x377   :  { %6108 = vmatpush3.bf16.msra.mxu0 %v6107_v56 }
 0x378   :  { %6110 = vmatprep.subr.bf16.mxu0 %v6109_v46  ;;  %3984 = vmatmul.mubr.f32.gmra.mrb[16].mxu1 %v9030_v45  ;;  %v6149_v0 = vpack.c.bf16 %v9035_v62, %v9034_v44  ;;  %v6153_v54 = vpack.c.bf16 %v9040_v57, %v9039_v23 }
 0x379   :  { %6184 = vmatpush3.bf16.msra.mxu1 %v8250_v35  ;;  %4261 = vmatprep.mubr.f32.mxu1 %v9033_v20  ;;  %v6151_v35 = vpack.c.bf16 %v9038_v27, %v9037_v33 }
 0x37a   :  { %6186 = vmatprep.subr.bf16.mxu1 %v8263_v32  ;;  %v9041_v32 = vld [vmem:[#allocation26_spill] sm:$0xff] }
 0x37b   :  { %6112 = vmatpush3.bf16.msra.mxu0 %v6111_v30 }
 0x37c   :  { %6146 = vmatprep.subr.bf16.mxu0 %v6145_v12 }
 0x37d   :  { %6188 = vmatpush3.bf16.msra.mxu1 %v8276_v53  ;;  %v9044_v53 = vand.u32 4294901760, %v9025_v49 }
 0x37e   :  { %3856 = vmatmul.mubr.f32.vlgmr.msra.gmra.mrb[14].mxu0 %v9036_v29  ;;  %6190 = vmatprep.subr.bf16.mxu1 %v8283_v40  ;;  %v9046_v40 = vand.u32 4294901760, %v8112_v21  ;;  %v9052_v21 = vand.u32 4294901760, %v8165_v37 }
 0x37f   :  { %3862 = vmatprep.mubr.f32.mxu0 %v8351_v11  ;;  %6148 = vmatpush3.bf16.msra.mxu0 %v6147_v22  ;;  %v9042_v11 = vand.u32 4294901760, %v9023_v3  ;;  %v6157_v16 = vpack.c.bf16 %v9045_v8, %v9044_v53  ;;  %v9048_v3 = vand.u32 4294901760, %v8135_v58  ;;  %v9056_v58 = vld [vmem:[#allocation33_spill] sm:$0xff] }
 0x380   :  { %6150 = vmatprep.subr.bf16.mxu0 %v6149_v0  ;;  %v6159_v41 = vpack.c.bf16 %v9047_v9, %v9046_v40 }
 0x381   :  { %v6155_v28 = vpack.c.bf16 %v9043_v55, %v9042_v11  ;;  %6192 = vmatpush3.bf16.msra.mxu1 %v8303_v6  ;;  %v9049_v6 = vand.u32 4294901760, %v8140_v15  ;;  %v9058_v15 = vld [vmem:[#allocation61_spill] sm:$0xff] }
 0x382   :  { %3865 = vmatmul.mubr.f32.gmra.mrb[16].mxu0 %v9041_v32  ;;  %6194 = vmatprep.subr.bf16.mxu1 %v8309_v47  ;;  %v9051_v47 = vand.u32 4294901760, %v8155_v52  ;;  %v9055_v52 = vld [vmem:[#allocation59_spill] sm:$0xff] }
 0x383   :  { %6152 = vmatpush3.bf16.msra.mxu0 %v6151_v35  ;;  %4150 = vmatprep.mubr.f32.mxu0 %v9033_v20  ;;  %v6161_v4 = vpack.c.bf16 %v9049_v6, %v9048_v3 }
 0x384   :  { %6154 = vmatprep.subr.bf16.mxu0 %v6153_v54  ;;  %v6163_v49 = vpack.c.bf16 %v9051_v47, %v9050_v2 }
 0x385   :  { %6196 = vmatpush3.bf16.msra.mxu1 %v8323_v24  ;;  %v6165_v24 = vpack.c.bf16 %v9053_v61, %v9052_v21 }
 0x386   :  { %6198 = vmatprep.subr.bf16.mxu1 %v8330_v60 }
 0x387   :  { %6156 = vmatpush3.bf16.msra.mxu0 %v6155_v28 }
 0x388   :  { %6158 = vmatprep.subr.bf16.mxu0 %v6157_v16 }
 0x389   :  { %6200 = vmatpush3.bf16.msra.mxu1 %v8340_v38 }
 0x38a   :  { %6202 = vmatprep.subr.bf16.mxu1 %v8347_v51 }
 0x38b   :  { %6160 = vmatpush3.bf16.msra.mxu0 %v6159_v41 }
 0x38c   :  { %6162 = vmatprep.subr.bf16.mxu0 %v6161_v4 }
 0x38d   :  { %6204 = vmatpush3.bf16.msra.mxu1 %v8358_v14  ;;  %v4347_v14 = vld [vmem:[%s8581_s9] ss:$0 sm:$0xff] }
 0x38e   :  { %6206 = vmatprep.subr.bf16.mxu1 %v8366_v5 }
 0x38f   :  { %6164 = vmatpush3.bf16.msra.mxu0 %v6163_v49 }
 0x390   :  { %6166 = vmatprep.subr.bf16.mxu0 %v6165_v24 }
 0x391   :  { %6208 = vmatpush3.bf16.msra.mxu1 %v8375_v10 }
 0x393   :  { %6168 = vmatpush3.bf16.msra.mxu0 %v9054_v34 }
 0x394   :  { %6170 = vmatprep.subr.bf16.mxu0 %v9055_v52  ;;  %4263 = vmatmul.mubr.f32.vlgmr.msra.gmra.mrb[18].mxu1 %v9010_v19 }
 0x395   :  { %4268 = vmatprep.mubr.f32.mxu1 %v8333_v31 }
 0x397   :  { %6172 = vmatpush3.bf16.msra.mxu0 %v9056_v58 }
 0x398   :  { %6174 = vmatprep.subr.bf16.mxu0 %v9057_v7  ;;  %4270 = vmatmul.mubr.f32.gmra.mrb[20].mxu1 %v9015_v50 }
 0x39b   :  { %6176 = vmatpush3.bf16.msra.mxu0 %v9058_v15 }
 0x39e   :  { %4152 = vmatmul.mubr.f32.vlgmr.msra.gmra.mrb[18].mxu0 %v9010_v19 }
 0x39f   :  { %4157 = vmatprep.mubr.f32.mxu0 %v8333_v31 }
 0x3a2   :  { %4159 = vmatmul.mubr.f32.gmra.mrb[20].mxu0 %v9015_v50 }
 0x3c0   :  { %v4656_v37 = vpop.f32.mrb[4].mxu1 }
 0x3c1   :  { %v4657_v60 = vpop.f32.mrb[5].mxu1 }
 0x3c2   :  { %v4658_v38 = vadd.f32 %v4657_v60, %v4656_v37 }
 0x3c8   :  { %v4621_v51 = vpop.f32.mrb[4].mxu0 }
 0x3c9   :  { %v4622_v5 = vpop.f32.mrb[5].mxu0 }
 0x3ca   :  { %v4623_v10 = vadd.f32 %v4622_v5, %v4621_v51 }
 0x3cc   :  { %v2564_v42 = vadd.f32 %v4623_v10, %v4347_v14 }
 0x3ce   :  { %v2796_v1 = vadd.f32 %v4658_v38, %v2564_v42 }
 0x3e0   :  { %v4726_v17 = vpop.f32.mrb[6].mxu1 }
 0x3e1   :  { %v4727_v48 = vpop.f32.mrb[7].mxu1 }
 0x3e2   :  { %v4728_v63 = vadd.f32 %v4727_v48, %v4726_v17 }
 0x3e9   :  { %v4691_v19 = vpop.f32.mrb[6].mxu0 }
 0x3ea   :  { %v4692_v36 = vpop.f32.mrb[7].mxu0 }
 0x3eb   :  { %v4693_v31 = vadd.f32 %v4692_v36, %v4691_v19 }
 0x3ed   :  { %v2934_v18 = vadd.f32 %v4693_v31, %v2796_v1 }
 0x3ef   :  { %v3042_v50 = vadd.f32 %v4728_v63, %v2934_v18 }
 0x3f0   :  { %6387 = shalt.err (!%p6384_p2)
}
 0x3f1   :  { %s6388_s16 = scalar_lea.hbm %s8585_s13, 128 }
 0x3f2   :  { %p6389_p3 = scmp.ne.s32.totalorder %s8585_s13, %s6388_s16  ;;  %p6392_p4 = scmp.lt.u32.totalorder %s6388_s16, %s8585_s13 }
 0x3f4   :  { %p6394_p5 = pnand %p6392_p4, %p6389_p3 }
 0x3f6   :  { %6397 = shalt.err (!%p6394_p5)
}
 0x3f7   :  { %4302 = dma.vmem_to_hbm [thread:$0]  %s4300_s26, 128, %s8585_s13, [#allocation13]  }
 0x3f8   :  { %s6487_s20 = smov [#allocation15]  }
 0x3f9   :  { %s4320_s1 = sshll.u32 %s6487_s20, 4  ;;  %s4321_s1 = int_to_ptr.vmem [resolvable:$true] %s4320_s1 }
 0x3fa   :  { %s6398_s22 = scalar_lea.vmem %s4321_s1, 256  ;;  %p6403_p7 = scmp.lt.s32.totalorder %s4321_s1, %s4321_s1 }
 0x3fb   :  { %p6399_p6 = scmp.ne.s32.totalorder %s4321_s1, %s6398_s22  ;;  %p6404_p8 = scmp.lt.s32.totalorder %s6398_s22, %s6398_s22 }
 0x3fd   :  { %p6405_p9 = por %p6404_p8, %p6403_p7 }
 0x3ff   :  { %p6406_p10 = pnand %p6405_p9, %p6399_p6 }
 0x401   :  { %6409 = shalt.err (!%p6406_p10)
}
 0x402   :  { %s6410_s2 = scalar_lea.hbm %s8587_s15, 256 }
 0x403   :  { %p6411_p11 = scmp.ne.s32.totalorder %s8587_s15, %s6410_s2  ;;  %p6414_p12 = scmp.lt.u32.totalorder %s6410_s2, %s8587_s15 }
 0x405   :  { %p6416_p13 = pnand %p6414_p12, %p6411_p11 }
 0x407   :  { %6419 = shalt.err (!%p6416_p13)
}
 0x408   :  { %4326 = dma.vmem_to_hbm [thread:$0]  %s4321_s1, 256, %s8587_s15, [#allocation16], %s6477_s28, %s6477_s28, %s6478_s29   ;;  %v4796_v13 = vpop.f32.mrb[8].mxu1 }
 0x409   :  { %v4797_v56 = vpop.f32.mrb[9].mxu1  ;;  %v4761_v59 = vpop.f32.mrb[8].mxu0  ;;  %s6488_s7 = smov [#allocation11]  }
 0x40a   :  { %v4798_v46 = vadd.f32 %v4797_v56, %v4796_v13  ;;  %v4762_v30 = vpop.f32.mrb[9].mxu0  ;;  %s4289_s8 = sshll.u32 %s6488_s7, 4  ;;  %s4290_s8 = int_to_ptr.vmem [resolvable:$true] %s4289_s8 }
 0x40b   :  { %v4763_v39 = vadd.f32 %v4762_v30, %v4761_v59  ;;  %s6420_s18 = scalar_lea.vmem %s4290_s8, 128  ;;  %p6425_p1 = scmp.lt.s32.totalorder %s4290_s8, %s4290_s8 }
 0x40c   :  { %p6421_p0 = scmp.ne.s32.totalorder %s4290_s8, %s6420_s18  ;;  %p6426_p2 = scmp.lt.s32.totalorder %s6420_s18, %s6420_s18 }
 0x40d   :  { %v3210_v25 = vadd.f32 %v4763_v39, %v3042_v50 }
 0x40e   :  { %p6427_p3 = por %p6426_p2, %p6425_p1 }
 0x40f   :  { %v3314_v12 = vadd.f32 %v4798_v46, %v3210_v25 }
 0x410   :  { %p6428_p4 = pnand %p6427_p3, %p6421_p0 }
 0x411   :  { %v3317_v45 = vmax.f32 %v3314_v12, 0.0 }
 0x413   :  { %4277 = vst [vmem:[#allocation11] sm:$0xff] %v3317_v45 }
 0x414   :  { %6431 = shalt.err (!%p6428_p4)
}
 0x415   :  { %s6432_s4 = scalar_lea.hbm %s8584_s12, 128 }
 0x416   :  { %p6433_p5 = scmp.ne.s32.totalorder %s8584_s12, %s6432_s4  ;;  %p6436_p6 = scmp.lt.u32.totalorder %s6432_s4, %s8584_s12 }
 0x418   :  { %p6438_p7 = pnand %p6436_p6, %p6433_p5 }
 0x41a   :  { %6441 = shalt.err (!%p6438_p7)
}
 0x41b   :  { %4292 = dma.vmem_to_hbm [thread:$0]  %s4290_s8, 128, %s8584_s12, [#allocation4]   ;;  %v4348_v29 = vld [vmem:[%s8583_s11] ss:$0 sm:$0xff] }
 0x41c   :  { %s6489_s11 = smov [#allocation14]  }
 0x41d   :  { %s4308_s12 = sshll.u32 %s6489_s11, 4  ;;  %s4309_s12 = int_to_ptr.vmem [resolvable:$true] %s4308_s12 }
 0x41e   :  { %s6442_s17 = scalar_lea.vmem %s4309_s12, 256  ;;  %p6447_p9 = scmp.lt.s32.totalorder %s4309_s12, %s4309_s12 }
 0x41f   :  { %p6443_p8 = scmp.ne.s32.totalorder %s4309_s12, %s6442_s17  ;;  %p6448_p10 = scmp.lt.s32.totalorder %s6442_s17, %s6442_s17 }
 0x421   :  { %p6449_p11 = por %p6448_p10, %p6447_p9 }
 0x423   :  { %p6450_p12 = pnand %p6449_p11, %p6443_p8 }
 0x427   :  { %v4869_v43 = vpop.f32.mrb[10].mxu1 }
 0x428   :  { %v4870_v26 = vpop.f32.mrb[11].mxu1 }
 0x429   :  { %v4871_v22 = vadd.f32 %v4870_v26, %v4869_v43 }
 0x42b   :  { %v4872_v20 = vpop.f32.mrb[12].mxu1 }
 0x42c   :  { %v4873_v44 = vpop.f32.mrb[13].mxu1 }
 0x42d   :  { %v4874_v62 = vadd.f32 %v4873_v44, %v4872_v20 }
 0x431   :  { %v4831_v0 = vpop.f32.mrb[10].mxu0 }
 0x432   :  { %v4832_v33 = vpop.f32.mrb[11].mxu0 }
 0x433   :  { %v4833_v27 = vadd.f32 %v4832_v33, %v4831_v0 }
 0x435   :  { %v3466_v35 = vadd.f32 %v4833_v27, %v4348_v29  ;;  %v4834_v23 = vpop.f32.mrb[12].mxu0 }
 0x436   :  { %v4835_v57 = vpop.f32.mrb[13].mxu0 }
 0x437   :  { %v3713_v54 = vadd.f32 %v4871_v22, %v3466_v35  ;;  %v4836_v32 = vadd.f32 %v4835_v57, %v4834_v23 }
 0x439   :  { %v3481_v11 = vadd.f32 %v4836_v32, %v4348_v29 }
 0x43b   :  { %v3720_v55 = vadd.f32 %v4874_v62, %v3481_v11 }
 0x447   :  { %v4945_v28 = vpop.f32.mrb[14].mxu1 }
 0x448   :  { %v4946_v53 = vpop.f32.mrb[15].mxu1 }
 0x449   :  { %v4947_v8 = vadd.f32 %v4946_v53, %v4945_v28 }
 0x44b   :  { %v4948_v16 = vpop.f32.mrb[16].mxu1 }
 0x44c   :  { %v4949_v40 = vpop.f32.mrb[17].mxu1 }
 0x44d   :  { %v4950_v9 = vadd.f32 %v4949_v40, %v4948_v16 }
 0x451   :  { %v4907_v41 = vpop.f32.mrb[14].mxu0 }
 0x452   :  { %v4908_v3 = vpop.f32.mrb[15].mxu0 }
 0x453   :  { %v4909_v6 = vadd.f32 %v4908_v3, %v4907_v41 }
 0x455   :  { %v3858_v4 = vadd.f32 %v4909_v6, %v3713_v54  ;;  %v4910_v2 = vpop.f32.mrb[16].mxu0 }
 0x456   :  { %v4911_v47 = vpop.f32.mrb[17].mxu0 }
 0x457   :  { %v3975_v49 = vadd.f32 %v4947_v8, %v3858_v4  ;;  %v4912_v21 = vadd.f32 %v4911_v47, %v4910_v2 }
 0x459   :  { %v3867_v61 = vadd.f32 %v4912_v21, %v3720_v55 }
 0x45b   :  { %v3986_v24 = vadd.f32 %v4950_v9, %v3867_v61 }
 0x467   :  { %v5021_v34 = vpop.f32.mrb[18].mxu1 }
 0x468   :  { %v5022_v52 = vpop.f32.mrb[19].mxu1 }
 0x469   :  { %v5023_v58 = vadd.f32 %v5022_v52, %v5021_v34 }
 0x46b   :  { %v5024_v7 = vpop.f32.mrb[20].mxu1 }
 0x46c   :  { %v5025_v15 = vpop.f32.mrb[21].mxu1 }
 0x46d   :  { %v5026_v37 = vadd.f32 %v5025_v15, %v5024_v7 }
 0x471   :  { %v4983_v60 = vpop.f32.mrb[18].mxu0 }
 0x472   :  { %v4984_v38 = vpop.f32.mrb[19].mxu0 }
 0x473   :  { %v4985_v51 = vadd.f32 %v4984_v38, %v4983_v60 }
 0x475   :  { %v4154_v14 = vadd.f32 %v4985_v51, %v3975_v49  ;;  %v4986_v5 = vpop.f32.mrb[20].mxu0 }
 0x476   :  { %v4987_v10 = vpop.f32.mrb[21].mxu0 }
 0x477   :  { %v4265_v42 = vadd.f32 %v5023_v58, %v4154_v14  ;;  %v4988_v1 = vadd.f32 %v4987_v10, %v4986_v5 }
 0x479   :  { %v4275_v17 = vmax.f32 %v4265_v42, 0.0  ;;  %v4161_v48 = vadd.f32 %v4988_v1, %v3986_v24 }
 0x47b   :  { %4279 = vst [vmem:[#allocation14] sm:$0xff] %v4275_v17  ;;  %v4272_v63 = vadd.f32 %v5026_v37, %v4161_v48 }
 0x47d   :  { %v4276_v19 = vmax.f32 %v4272_v63, 0.0 }
 0x47f   :  { %4280 = vst [vmem:[#allocation14 + $0x8] sm:$0xff] %v4276_v19 }
 0x480   :  { %6453 = shalt.err (!%p6450_p12)
}
 0x481   :  { %s9059_s22 = sld [smem:[#allocation66_spill]] }
 0x487   :  { %s6454_s0 = scalar_lea.hbm %s9059_s22, 256 }
 0x488   :  { %p6455_p13 = scmp.ne.s32.totalorder %s9059_s22, %s6454_s0  ;;  %p6458_p0 = scmp.lt.u32.totalorder %s6454_s0, %s9059_s22 }
 0x48a   :  { %p6460_p1 = pnand %p6458_p0, %p6455_p13 }
 0x48c   :  { %6463 = shalt.err (!%p6460_p1)
}
 0x48d   :  { %4314 = dma.vmem_to_hbm [thread:$0]  %s4309_s12, 256, %s9059_s22, [#allocation13], %s6477_s28, %s6477_s28, %s6478_s29  }
 0x48e   :  { %6470 = dma.done.wait [#allocation4], 128  }
 0x48f   :  { %6471 = vsyncadd [#allocation4], 4294967168 }
 0x490   :  { %6472 = dma.done.wait [#allocation13], 384  }
 0x491   :  { %6473 = vsyncadd [#allocation13], 4294966912 }
 0x492   :  { %6474 = dma.done.wait [#allocation16], 256  }
 0x493   :  { %6475 = vsyncadd [#allocation16], 4294967040 }
 0x494   :  { %4339 = vsyncpa [#allocation3], 1 }
 0x495   :  { %4340 = vsyncpa [#allocation6], 1 }
 0x496   :  { %4341 = vsyncpa [#allocation9], 1 }
 0x497   :  { %4342 = vsyncpa [#allocation4], 1 }
 0x498   :  { %4343 = vsyncpa [#allocation13], 1 }
 0x499   :  { %4344 = vsyncpa [#allocation16], 1 }

</bundles_post_ra>
